<compile_context>
chip_gen: v7x
topology: tpu7x:2x2x1
jax: 0.10.0
libtpu: 0.0.40
codegen_flags: <defaults>
</compile_context>

<pallas_src>
import math

import jax
import jax.numpy as jnp
import numpy as np
from jax import lax
from jax.experimental import pallas as pl
from jax.experimental.pallas import tpu as pltpu

# ------------------------- small synthetic config --------------------------
VOCAB = 64
D = 32           # hidden_size
H = 4            # n_heads
DH = D // H      # head_dim
INTER = 64       # intermediate_size
N_LAYERS = 2
EPS = 1e-5
ROPE_THETA = 10000.0
NEG_INF = -1e30


# ------------------------------ fused kernel --------------------------------
def _make_cohere_kernel(batch: int, seq: int):
    bs = batch * seq

    def kernel(ids_ref,        # SMEM (B*S,) int32   (scalar prefetch)
               table_ref,      # (VOCAB, D)     f32  (grid-invariant)
               lnw_ref,        # (1, 1, D)      f32  (this layer's norm weight)
               wqkvr_ref,      # (1, D, 5*D)    bf16 [Q|K|V|Q@R|K@R], scale folded
               wo_ref,         # (1, D, D)      bf16
               wgu_ref,        # (1, D, 2*I)    bf16 [gate|up]
               wdn_ref,        # (1, INTER, D)  bf16
               cs_ref,         # (2, B*S, D)    f32  [cos; sin], pre-broadcast
               flnw_ref,       # (1, D)         f32  (final norm weight)
               o_ref,          # (B*S, D)       f32  (written on last layer only)
               h_scr):         # VMEM (B*S, D)  f32  residual stream (persists)
        l = pl.program_id(0)
        n_layers = pl.num_programs(0)

        def cohere_norm(x, w):
            # CohereLayerNorm: mean-centered, rsqrt(var + eps), weight, no bias.
            mu = jnp.mean(x, axis=-1, keepdims=True)
            xc = x - mu
            var = jnp.mean(xc * xc, axis=-1, keepdims=True)
            return xc * lax.rsqrt(var + EPS) * w

        # ---- embedding gather, only on the first grid step ----
        @pl.when(l == 0)
        def _():
            def gather_row(i, carry):
                tok = ids_ref[i]
                h_scr[pl.ds(i, 1), :] = table_ref[pl.ds(tok, 1), :]
                return carry
            lax.fori_loop(0, bs, gather_row, 0)
            # TODO(synk): at real vocab (256K x 8K) keep the table in HBM
            # (BlockSpec(memory_space=pl.ANY)) and gather rows with
            # double-buffered pltpu.make_async_copy driven by the SMEM ids.

        h = h_scr[...]                                   # (B*S, D) f32

        hcn = cohere_norm(h, lnw_ref[0])                 # shared by attn & MLP
        hcn16 = hcn.astype(jnp.bfloat16)

        # ---- fused QKV(+rotated) projection: ONE 2D matmul, N = 5*D ----
        qkvr = jnp.dot(hcn16, wqkvr_ref[0],
                       preferred_element_type=jnp.float32)   # (B*S, 5*D) f32

        # ---- RoPE (rotation + attn scale folded into weights => two FMAs) ----
        cos = cs_ref[0]                                  # (B*S, D) leading-axis index
        sin = cs_ref[1]
        q = qkvr[:, 0 * D:1 * D] * cos + qkvr[:, 3 * D:4 * D] * sin
        k = qkvr[:, 1 * D:2 * D] * cos + qkvr[:, 4 * D:5 * D] * sin
        v = qkvr[:, 2 * D:3 * D]
        q16 = q.astype(jnp.bfloat16)                     # bf16 MXU operands
        k16 = k.astype(jnp.bfloat16)
        v16 = v.astype(jnp.bfloat16)

        # ---- causal mask (per sequence; batch only appears as einsum batch dim) ----
        rows = lax.broadcasted_iota(jnp.int32, (seq, seq), 0)
        cols = lax.broadcasted_iota(jnp.int32, (seq, seq), 1)
        causal = (cols <= rows)[None]                    # (1, S, S)

        # ---- attention: per-head loop, batched over B inside each einsum ----
        head_out = []
        for hd in range(H):
            sl = slice(hd * DH, (hd + 1) * DH)
            # leading-dim split (B*S, DH) -> (B, S, DH): pure re-indexing, no relayout
            qh = q16[:, sl].reshape(batch, seq, DH)
            kh = k16[:, sl].reshape(batch, seq, DH)
            vh = v16[:, sl].reshape(batch, seq, DH)
            s = jnp.einsum('bqd,bkd->bqk', qh, kh,
                           preferred_element_type=jnp.float32)   # (B, S, S)
            s = jnp.where(causal, s, NEG_INF)
            m = jnp.max(s, axis=-1, keepdims=True)
            p = jnp.exp(s - m)
            p = p / jnp.sum(p, axis=-1, keepdims=True)           # exact softmax
            oh = jnp.einsum('bqk,bkd->bqd', p.astype(jnp.bfloat16), vh,
                            preferred_element_type=jnp.float32)  # (B, S, DH)
            head_out.append(oh.reshape(bs, DH))
        # lane-concat heads, then a SINGLE o_proj matmul (B*S, D) @ (D, D)
        attn_in = jnp.concatenate(head_out, axis=-1).astype(jnp.bfloat16)
        attn = jnp.dot(attn_in, wo_ref[0],
                       preferred_element_type=jnp.float32)       # (B*S, D)

        # ---- SwiGLU MLP: fused gate|up projection (lane-dense N = 2*INTER) ----
        gu = jnp.dot(hcn16, wgu_ref[0], preferred_element_type=jnp.float32)
        gate = gu[:, 0:INTER]
        up = gu[:, INTER:2 * INTER]
        act = gate / (1.0 + jnp.exp(-gate)) * up                 # exact SiLU * up
        mlp = jnp.dot(act.astype(jnp.bfloat16), wdn_ref[0],
                      preferred_element_type=jnp.float32)        # (B*S, D)

        # Cohere parallel residual: x + attn(norm(x)) + mlp(norm(x))
        h_new = h + attn + mlp
        h_scr[...] = h_new

        # ---- final CohereLayerNorm + writeback on the last layer only ----
        # (at real D >= 128 this store is lane-dense; at toy D=32 it is a tiny
        #  masked store and irrelevant)
        @pl.when(l == n_layers - 1)
        def _():
            o_ref[...] = cohere_norm(h_new, flnw_ref[...])

    return kernel


# ------------------------------ host-side prep ------------------------------
def _rot_matrix_head():
    # rotate_half (interleaved): (x @ R)[2i] = -x[2i+1], (x @ R)[2i+1] = x[2i]
    R = np.zeros((DH, DH), dtype=np.float32)
    for j in range(0, DH, 2):
        R[j + 1, j] = -1.0
        R[j, j + 1] = 1.0
    return jnp.asarray(R)


def _rope_cos_sin_head(S):
    # HF Cohere rotary: repeat_interleave(freqs, 2) -> interleaved cos/sin per head.
    inv_freq = 1.0 / (ROPE_THETA ** (jnp.arange(0, DH, 2, dtype=jnp.float32) / DH))
    ang = jnp.arange(S, dtype=jnp.float32)[:, None] * inv_freq[None, :]   # (S, DH/2)
    cos = jnp.repeat(jnp.cos(ang), 2, axis=-1)                            # (S, DH)
    sin = jnp.repeat(jnp.sin(ang), 2, axis=-1)                            # (S, DH)
    return cos, sin


def _rope_cos_sin_folded(B, S):
    # Pre-broadcast to the folded-batch hidden layout (B*S, D = H*DH), packed as
    # (2, B*S, D) so the kernel indexes the leading axis (no lane slicing).
    cos, sin = _rope_cos_sin_head(S)
    cos_full = jnp.tile(jnp.tile(cos, (1, H)), (B, 1))     # (B*S, D)
    sin_full = jnp.tile(jnp.tile(sin, (1, H)), (B, 1))
    return jnp.stack([cos_full, sin_full], axis=0)          # (2, B*S, D)


def init_params(key):
    # Natural (PyTorch-like, already transposed to [in, out]) parameter shapes.
    std = 0.02
    keys = jax.random.split(key, 2 + 7 * N_LAYERS)
    it = iter(keys)
    params = {
        "embed": jax.random.normal(next(it), (VOCAB, D), jnp.float32) * std,
        "final_ln": 1.0 + 0.05 * jax.random.normal(next(it), (1, D), jnp.float32),
        "layers": [],
    }
    for _ in range(N_LAYERS):
        params["layers"].append({
            "ln_w":   1.0 + 0.05 * jax.random.normal(next(it), (1, D), jnp.float32),
            "w_qkv":  jax.random.normal(next(it), (D, 3 * D), jnp.float32) * std,
            "w_o":    jax.random.normal(next(it), (D, D), jnp.float32) * std,
            "w_gate": jax.random.normal(next(it), (D, INTER), jnp.float32) * std,
            "w_up":   jax.random.normal(next(it), (D, INTER), jnp.float32) * std,
            "w_down": jax.random.normal(next(it), (INTER, D), jnp.float32) * std,
        })
    return params


def prepare_fused_params(params):
    """Offline weight fusion: stack layers, fold RoPE rotation + attention scale
    into W_q / W_k, fuse QKV(+rotated) into one (D, 5*D) slab, fuse gate|up,
    cast matmul weights to bf16 (f32 accumulation happens in-kernel)."""
    Rh = _rot_matrix_head()
    scale = 1.0 / math.sqrt(DH)

    def fold_rot(W):                                   # (D, D) head-major columns
        Wh = W.reshape(D, H, DH)
        return jnp.einsum('dhf,fg->dhg', Wh, Rh).reshape(D, D)

    lnw, wqkvr, wo, wgu, wdn = [], [], [], [], []
    for lp in params["layers"]:
        Wq = lp["w_qkv"][:, 0:D] * scale               # attn scale folded into q
        Wk = lp["w_qkv"][:, D:2 * D]
        Wv = lp["w_qkv"][:, 2 * D:3 * D]
        wqkvr.append(jnp.concatenate(
            [Wq, Wk, Wv, fold_rot(Wq), fold_rot(Wk)], axis=-1))            # (D, 5*D)
        wo.append(lp["w_o"])                                               # (D, D)
        wgu.append(jnp.concatenate([lp["w_gate"], lp["w_up"]], axis=-1))   # (D, 2*I)
        wdn.append(lp["w_down"])                                           # (I, D)
        lnw.append(lp["ln_w"])
    return {
        "embed":    params["embed"],                                   # (V, D)     f32
        "ln_w":     jnp.stack(lnw).astype(jnp.float32),                # (L, 1, D)  f32
        "w_qkvr":   jnp.stack(wqkvr).astype(jnp.bfloat16),             # (L, D, 5D)
        "w_o":      jnp.stack(wo).astype(jnp.bfloat16),                # (L, D, D)
        "w_gu":     jnp.stack(wgu).astype(jnp.bfloat16),               # (L, D, 2I)
        "w_down":   jnp.stack(wdn).astype(jnp.bfloat16),               # (L, I, D)
        "final_ln": params["final_ln"].astype(jnp.float32),            # (1, D)     f32
    }


def cohere_model_forward(input_ids, fused):
    # fused_utils.prepare_input_ids / prepare_cache are identity for a first
    # forward (start_pos = 0); the causal mask is built in-kernel.
    B, S = input_ids.shape
    BS = B * S
    cs = _rope_cos_sin_folded(B, S)
    ids = input_ids.reshape(-1).astype(jnp.int32)     # folded-batch row order b*S + s

    grid_spec = pltpu.PrefetchScalarGridSpec(
        num_scalar_prefetch=1,                        # token ids -> SMEM
        grid=(N_LAYERS,),                             # layer axis: weights streamed,
        in_specs=[                                    # residual stream stays in scratch
            pl.BlockSpec((VOCAB, D), lambda l, _ids: (0, 0),
                         pipeline_mode=pl.Buffered(1)),            # grid-invariant
            pl.BlockSpec((1, 1, D), lambda l, _ids: (l, 0, 0)),
            pl.BlockSpec((1, D, 5 * D), lambda l, _ids: (l, 0, 0)),
            pl.BlockSpec((1, D, D), lambda l, _ids: (l, 0, 0)),
            pl.BlockSpec((1, D, 2 * INTER), lambda l, _ids: (l, 0, 0)),
            pl.BlockSpec((1, INTER, D), lambda l, _ids: (l, 0, 0)),
            pl.BlockSpec((2, BS, D), lambda l, _ids: (0, 0, 0),
                         pipeline_mode=pl.Buffered(1)),            # grid-invariant
            pl.BlockSpec((1, D), lambda l, _ids: (0, 0),
                         pipeline_mode=pl.Buffered(1)),            # grid-invariant
        ],
        out_specs=pl.BlockSpec((BS, D), lambda l, _ids: (0, 0)),   # resident; written
        scratch_shapes=[pltpu.VMEM((BS, D), jnp.float32)],         # on last layer only
    )
    # NOTE: at real Cohere dims (D ~ 8K) the per-layer weight blocks must also be
    # tiled along K/N (~512-1024 tiles) to respect v7x's 64 MiB VMEM; the layer
    # grid axis already gives double-buffered weight streaming for free.
    out = pl.pallas_call(
        _make_cohere_kernel(B, S),
        out_shape=jax.ShapeDtypeStruct((BS, D), jnp.float32),
        grid_spec=grid_spec,
        compiler_params=pltpu.CompilerParams(
            dimension_semantics=("arbitrary",),       # layers are sequential (carried h)
            vmem_limit_bytes=48 * 1024 * 1024,
        ),
    )(ids, fused["embed"], fused["ln_w"], fused["w_qkvr"], fused["w_o"],
      fused["w_gu"], fused["w_down"], cs, fused["final_ln"])
    return out.reshape(B, S, D)


# ------------------------- pure-JAX reference (f32) -------------------------
def reference_forward(input_ids, params):
    B, S = input_ids.shape
    h = params["embed"][input_ids]                     # (B, S, D)
    cos, sin = _rope_cos_sin_head(S)
    cos4 = cos[None, :, None, :]
    sin4 = sin[None, :, None, :]
    causal = jnp.tril(jnp.ones((S, S), dtype=bool))[None, None]

    def norm(x, w):
        mu = jnp.mean(x, axis=-1, keepdims=True)
        xc = x - mu
        var = jnp.mean(xc * xc, axis=-1, keepdims=True)
        return xc * lax.rsqrt(var + EPS) * w

    def rot_half(x):                                   # interleaved rotate_half
        x1 = x[..., 0::2]
        x2 = x[..., 1::2]
        return jnp.stack([-x2, x1], axis=-1).reshape(x.shape)

    for lp in params["layers"]:
        n = norm(h, lp["ln_w"])
        q = (n @ lp["w_qkv"][:, 0:D]).reshape(B, S, H, DH)
        k = (n @ lp["w_qkv"][:, D:2 * D]).reshape(B, S, H, DH)
        v = (n @ lp["w_qkv"][:, 2 * D:3 * D]).reshape(B, S, H, DH)
        q = q * cos4 + rot_half(q) * sin4
        k = k * cos4 + rot_half(k) * sin4
        s = jnp.einsum('bqhd,bkhd->bhqk', q, k) / math.sqrt(DH)
        s = jnp.where(causal, s, NEG_INF)
        p = jax.nn.softmax(s, axis=-1)
        o = jnp.einsum('bhqk,bkhd->bqhd', p, v).reshape(B, S, D)
        attn = o @ lp["w_o"]
        mlp = (jax.nn.silu(n @ lp["w_gate"]) * (n @ lp["w_up"])) @ lp["w_down"]
        h = h + attn + mlp
    return norm(h, params["final_ln"])


if __name__ == "__main__":
    B, S = 2, 8
    key = jax.random.PRNGKey(0)
    pkey, ikey = jax.random.split(key)
    params = init_params(pkey)
    fused = prepare_fused_params(params)
    input_ids = jax.random.randint(ikey, (B, S), 0, VOCAB, dtype=jnp.int32)

    out = cohere_model_forward(input_ids, fused)
    out = jax.block_until_ready(out)

    assert out.shape == (B, S, D), out.shape
    assert bool(jnp.all(jnp.isfinite(out)))

    # Correctness vs. a pure-JAX f32 reference of the original module math.
    # Tolerance is loose because matmul weights/activations are bf16 in-kernel.
    ref = reference_forward(input_ids, params)
    err = float(jnp.max(jnp.abs(out - ref)))
    assert err < 0.15, f"max abs err vs reference too large: {err}"

    print("KERNEL_OK")
</pallas_src>

<mosaic_0001>
module attributes {stable_mosaic.version = 11 : i64} {
  func.func @kernel(%arg0: i32, %arg1: memref<16xi32, #tpu.memory_space<smem>>, %arg2: memref<64x32xf32, #tpu.memory_space<vmem>>, %arg3: memref<1x1x32xf32, #tpu.memory_space<vmem>>, %arg4: memref<1x32x160xbf16, #tpu.memory_space<vmem>>, %arg5: memref<1x32x32xbf16, #tpu.memory_space<vmem>>, %arg6: memref<1x32x128xbf16, #tpu.memory_space<vmem>>, %arg7: memref<1x64x32xbf16, #tpu.memory_space<vmem>>, %arg8: memref<2x16x32xf32, #tpu.memory_space<vmem>>, %arg9: memref<1x32xf32, #tpu.memory_space<vmem>>, %arg10: memref<16x32xf32, #tpu.memory_space<vmem>>, %arg11: memref<16x32xf32, #tpu.memory_space<vmem>>) attributes {dimension_semantics = [#tpu.dimension_semantics<arbitrary>], iteration_bounds = array<i64: 2>, scalar_prefetch = 1 : i64, scratch_operands = 1 : i64, tpu.core_type = #tpu.core_type<tc>, window_params = [{pipeline_mode = #tpu.pipeline_mode<synchronous>, transform_indices = @transform_0, window_bounds = array<i64: 64, 32>}, {transform_indices = @transform_1, window_bounds = array<i64: 1, 1, 32>}, {transform_indices = @transform_2, window_bounds = array<i64: 1, 32, 160>}, {transform_indices = @transform_3, window_bounds = array<i64: 1, 32, 32>}, {transform_indices = @transform_4, window_bounds = array<i64: 1, 32, 128>}, {transform_indices = @transform_5, window_bounds = array<i64: 1, 64, 32>}, {pipeline_mode = #tpu.pipeline_mode<synchronous>, transform_indices = @transform_6, window_bounds = array<i64: 2, 16, 32>}, {pipeline_mode = #tpu.pipeline_mode<synchronous>, transform_indices = @transform_7, window_bounds = array<i64: 1, 32>}, {pipeline_mode = #tpu.pipeline_mode<synchronous>, transform_indices = @transform_8, window_bounds = array<i64: 16, 32>}]} {
    %c0_i32 = arith.constant 0 : i32
    %0 = arith.cmpi eq, %arg0, %c0_i32 : i32
    %1 = arith.extui %0 : i1 to i32
    %c0_i32_0 = arith.constant 0 : i32
    %2 = arith.cmpi ne, %1, %c0_i32_0 : i32
    scf.if %2 {
      %c0_i32_55 = arith.constant 0 : i32
      %c16_i32 = arith.constant 16 : i32
      %169 = arith.addi %c0_i32_55, %c16_i32 : i32
      %c1_i32_56 = arith.constant 1 : i32
      scf.for %arg12 = %c0_i32_55 to %169 step %c1_i32_56  : i32 {
        %170 = arith.index_cast %arg12 : i32 to index
        %171 = memref.load %arg1[%170] : memref<16xi32, #tpu.memory_space<smem>>
        %172 = arith.index_cast %171 : i32 to index
        %c0_58 = arith.constant 0 : index
        %173 = vector.load %arg2[%172, %c0_58] : memref<64x32xf32, #tpu.memory_space<vmem>>, vector<1x32xf32>
        %174 = arith.index_cast %arg12 : i32 to index
        %c0_59 = arith.constant 0 : index
        %175 = vector.load %arg11[%174, %c0_59] : memref<16x32xf32, #tpu.memory_space<vmem>>, vector<1x32xf32>
        tpu.vector_store %arg11[%174, %c0_59], %173 {strides = array<i32>} : memref<16x32xf32, #tpu.memory_space<vmem>>, vector<1x32xf32>,
      }
      %c16_i32_57 = arith.constant 16 : i32
    } else {
    }
    %c0 = arith.constant 0 : index
    %c0_1 = arith.constant 0 : index
    %3 = vector.load %arg11[%c0, %c0_1] : memref<16x32xf32, #tpu.memory_space<vmem>>, vector<16x32xf32>
    %c0_2 = arith.constant 0 : index
    %c0_3 = arith.constant 0 : index
    %c0_4 = arith.constant 0 : index
    %4 = vector.load %arg3[%c0_2, %c0_3, %c0_4] : memref<1x1x32xf32, #tpu.memory_space<vmem>>, vector<1x1x32xf32>
    %5 = vector.shape_cast %4 : vector<1x1x32xf32> to vector<1x32xf32>
    %cst = arith.constant dense<0.000000e+00> : vector<16xf32>
    %6 = vector.multi_reduction <add>, %3, %cst [1] : vector<16x32xf32> to vector<16xf32>
    %7 = vector.shape_cast %6 : vector<16xf32> to vector<16x1xf32>
    %cst_5 = arith.constant 3.200000e+01 : f32
    %8 = vector.broadcast %cst_5 : f32 to vector<16x1xf32>
    %9 = arith.divf %7, %8 : vector<16x1xf32>
    %10 = vector.broadcast %9 : vector<16x1xf32> to vector<16x32xf32>
    %11 = arith.subf %3, %10 : vector<16x32xf32>
    %12 = arith.mulf %11, %11 : vector<16x32xf32>
    %cst_6 = arith.constant dense<0.000000e+00> : vector<16xf32>
    %13 = vector.multi_reduction <add>, %12, %cst_6 [1] : vector<16x32xf32> to vector<16xf32>
    %14 = vector.shape_cast %13 : vector<16xf32> to vector<16x1xf32>
    %cst_7 = arith.constant 3.200000e+01 : f32
    %15 = vector.broadcast %cst_7 : f32 to vector<16x1xf32>
    %16 = arith.divf %14, %15 : vector<16x1xf32>
    %cst_8 = arith.constant 9.99999974E-6 : f32
    %17 = vector.broadcast %cst_8 : f32 to vector<16x1xf32>
    %18 = arith.addf %16, %17 : vector<16x1xf32>
    %19 = math.rsqrt %18 : vector<16x1xf32>
    %20 = vector.broadcast %19 : vector<16x1xf32> to vector<16x32xf32>
    %21 = arith.mulf %11, %20 : vector<16x32xf32>
    %22 = vector.broadcast %5 : vector<1x32xf32> to vector<16x32xf32>
    %23 = arith.mulf %21, %22 : vector<16x32xf32>
    %24 = arith.truncf %23 : vector<16x32xf32> to vector<16x32xbf16>
    %c0_9 = arith.constant 0 : index
    %c0_10 = arith.constant 0 : index
    %c0_11 = arith.constant 0 : index
    %25 = vector.load %arg4[%c0_9, %c0_10, %c0_11] : memref<1x32x160xbf16, #tpu.memory_space<vmem>>, vector<1x32x160xbf16>
    %26 = vector.shape_cast %25 : vector<1x32x160xbf16> to vector<32x160xbf16>
    %cst_12 = arith.constant dense<0.000000e+00> : vector<16x160xf32>
    %27 = tpu.matmul %24, %26, %cst_12 {dimension_numbers = #tpu.dot_dimension_numbers<[1], [0], [0], [1], [0, 0, 1, 1], [], []>} : vector<16x32xbf16>, vector<32x160xbf16>, vector<16x160xf32> -> vector<16x160xf32>
    %c0_13 = arith.constant 0 : index
    %c0_14 = arith.constant 0 : index
    %c0_15 = arith.constant 0 : index
    %28 = vector.load %arg8[%c0_13, %c0_14, %c0_15] : memref<2x16x32xf32, #tpu.memory_space<vmem>>, vector<1x16x32xf32>
    %29 = vector.shape_cast %28 : vector<1x16x32xf32> to vector<16x32xf32>
    %c1 = arith.constant 1 : index
    %c0_16 = arith.constant 0 : index
    %c0_17 = arith.constant 0 : index
    %30 = vector.load %arg8[%c1, %c0_16, %c0_17] : memref<2x16x32xf32, #tpu.memory_space<vmem>>, vector<1x16x32xf32>
    %31 = vector.shape_cast %30 : vector<1x16x32xf32> to vector<16x32xf32>
    %32 = vector.extract_strided_slice %27 {offsets = [0, 0], sizes = [16, 32], strides = [1, 1]} : vector<16x160xf32> to vector<16x32xf32>
    %33 = arith.mulf %32, %29 : vector<16x32xf32>
    %34 = vector.extract_strided_slice %27 {offsets = [0, 96], sizes = [16, 32], strides = [1, 1]} : vector<16x160xf32> to vector<16x32xf32>
    %35 = arith.mulf %34, %31 : vector<16x32xf32>
    %36 = arith.addf %33, %35 : vector<16x32xf32>
    %37 = vector.extract_strided_slice %27 {offsets = [0, 32], sizes = [16, 32], strides = [1, 1]} : vector<16x160xf32> to vector<16x32xf32>
    %38 = arith.mulf %37, %29 : vector<16x32xf32>
    %39 = vector.extract_strided_slice %27 {offsets = [0, 128], sizes = [16, 32], strides = [1, 1]} : vector<16x160xf32> to vector<16x32xf32>
    %40 = arith.mulf %39, %31 : vector<16x32xf32>
    %41 = arith.addf %38, %40 : vector<16x32xf32>
    %42 = vector.extract_strided_slice %27 {offsets = [0, 64], sizes = [16, 32], strides = [1, 1]} : vector<16x160xf32> to vector<16x32xf32>
    %43 = arith.truncf %36 : vector<16x32xf32> to vector<16x32xbf16>
    %44 = arith.truncf %41 : vector<16x32xf32> to vector<16x32xbf16>
    %45 = arith.truncf %42 : vector<16x32xf32> to vector<16x32xbf16>
    %46 = tpu.iota {dimensions = array<i32: 0>} : vector<8x8xi32>
    %47 = tpu.iota {dimensions = array<i32: 1>} : vector<8x8xi32>
    %48 = arith.cmpi sle, %47, %46 : vector<8x8xi32>
    %49 = vector.shape_cast %48 : vector<8x8xi1> to vector<1x8x8xi1>
    %50 = vector.extract_strided_slice %43 {offsets = [0, 0], sizes = [16, 8], strides = [1, 1]} : vector<16x32xbf16> to vector<16x8xbf16>
    %51 = vector.shape_cast %50 : vector<16x8xbf16> to vector<2x8x8xbf16>
    %52 = vector.extract_strided_slice %44 {offsets = [0, 0], sizes = [16, 8], strides = [1, 1]} : vector<16x32xbf16> to vector<16x8xbf16>
    %53 = vector.shape_cast %52 : vector<16x8xbf16> to vector<2x8x8xbf16>
    %54 = vector.extract_strided_slice %45 {offsets = [0, 0], sizes = [16, 8], strides = [1, 1]} : vector<16x32xbf16> to vector<16x8xbf16>
    %55 = vector.shape_cast %54 : vector<16x8xbf16> to vector<2x8x8xbf16>
    "tpu.trace_start"() <{level = 10 : i32, message = "bqd,bkd->bqk"}> : () -> ()
    %cst_18 = arith.constant dense<0.000000e+00> : vector<2x8x8xf32>
    %56 = tpu.matmul %51, %53, %cst_18 {dimension_numbers = #tpu.dot_dimension_numbers<[2], [2], [1], [1], [0, 0, 0, 1, 1, 1], [0], [0]>} : vector<2x8x8xbf16>, vector<2x8x8xbf16>, vector<2x8x8xf32> -> vector<2x8x8xf32>
    %cst_19 = arith.constant -1.000000e+30 : f32
    "tpu.trace_stop"() : () -> ()
    %57 = vector.shape_cast %49 : vector<1x8x8xi1> to vector<1x8x8xi1>
    %58 = vector.broadcast %57 : vector<1x8x8xi1> to vector<2x8x8xi1>
    %59 = vector.broadcast %cst_19 : f32 to vector<2x8x8xf32>
    %60 = arith.select %58, %56, %59 : vector<2x8x8xi1>, vector<2x8x8xf32>
    %cst_20 = arith.constant dense<0xFF800000> : vector<2x8xf32>
    %61 = vector.multi_reduction <maximumf>, %60, %cst_20 [2] : vector<2x8x8xf32> to vector<2x8xf32>
    %62 = vector.shape_cast %61 : vector<2x8xf32> to vector<2x8x1xf32>
    %63 = vector.broadcast %62 : vector<2x8x1xf32> to vector<2x8x8xf32>
    %64 = arith.subf %60, %63 : vector<2x8x8xf32>
    %65 = math.exp %64 : vector<2x8x8xf32>
    %cst_21 = arith.constant dense<0.000000e+00> : vector<2x8xf32>
    %66 = vector.multi_reduction <add>, %65, %cst_21 [2] : vector<2x8x8xf32> to vector<2x8xf32>
    %67 = vector.shape_cast %66 : vector<2x8xf32> to vector<2x8x1xf32>
    %68 = vector.broadcast %67 : vector<2x8x1xf32> to vector<2x8x8xf32>
    %69 = arith.divf %65, %68 : vector<2x8x8xf32>
    %70 = arith.truncf %69 : vector<2x8x8xf32> to vector<2x8x8xbf16>
    "tpu.trace_start"() <{level = 10 : i32, message = "bqk,bkd->bqd"}> : () -> ()
    %cst_22 = arith.constant dense<0.000000e+00> : vector<2x8x8xf32>
    %71 = tpu.matmul %70, %55, %cst_22 {dimension_numbers = #tpu.dot_dimension_numbers<[2], [1], [1], [2], [0, 0, 0, 1, 1, 2], [0], [0]>} : vector<2x8x8xbf16>, vector<2x8x8xbf16>, vector<2x8x8xf32> -> vector<2x8x8xf32>
    "tpu.trace_stop"() : () -> ()
    %72 = vector.shape_cast %71 : vector<2x8x8xf32> to vector<16x8xf32>
    %73 = vector.extract_strided_slice %43 {offsets = [0, 8], sizes = [16, 8], strides = [1, 1]} : vector<16x32xbf16> to vector<16x8xbf16>
    %74 = vector.shape_cast %73 : vector<16x8xbf16> to vector<2x8x8xbf16>
    %75 = vector.extract_strided_slice %44 {offsets = [0, 8], sizes = [16, 8], strides = [1, 1]} : vector<16x32xbf16> to vector<16x8xbf16>
    %76 = vector.shape_cast %75 : vector<16x8xbf16> to vector<2x8x8xbf16>
    %77 = vector.extract_strided_slice %45 {offsets = [0, 8], sizes = [16, 8], strides = [1, 1]} : vector<16x32xbf16> to vector<16x8xbf16>
    %78 = vector.shape_cast %77 : vector<16x8xbf16> to vector<2x8x8xbf16>
    "tpu.trace_start"() <{level = 10 : i32, message = "bqd,bkd->bqk"}> : () -> ()
    %cst_23 = arith.constant dense<0.000000e+00> : vector<2x8x8xf32>
    %79 = tpu.matmul %74, %76, %cst_23 {dimension_numbers = #tpu.dot_dimension_numbers<[2], [2], [1], [1], [0, 0, 0, 1, 1, 1], [0], [0]>} : vector<2x8x8xbf16>, vector<2x8x8xbf16>, vector<2x8x8xf32> -> vector<2x8x8xf32>
    %cst_24 = arith.constant -1.000000e+30 : f32
    "tpu.trace_stop"() : () -> ()
    %80 = vector.shape_cast %49 : vector<1x8x8xi1> to vector<1x8x8xi1>
    %81 = vector.broadcast %80 : vector<1x8x8xi1> to vector<2x8x8xi1>
    %82 = vector.broadcast %cst_24 : f32 to vector<2x8x8xf32>
    %83 = arith.select %81, %79, %82 : vector<2x8x8xi1>, vector<2x8x8xf32>
    %cst_25 = arith.constant dense<0xFF800000> : vector<2x8xf32>
    %84 = vector.multi_reduction <maximumf>, %83, %cst_25 [2] : vector<2x8x8xf32> to vector<2x8xf32>
    %85 = vector.shape_cast %84 : vector<2x8xf32> to vector<2x8x1xf32>
    %86 = vector.broadcast %85 : vector<2x8x1xf32> to vector<2x8x8xf32>
    %87 = arith.subf %83, %86 : vector<2x8x8xf32>
    %88 = math.exp %87 : vector<2x8x8xf32>
    %cst_26 = arith.constant dense<0.000000e+00> : vector<2x8xf32>
    %89 = vector.multi_reduction <add>, %88, %cst_26 [2] : vector<2x8x8xf32> to vector<2x8xf32>
    %90 = vector.shape_cast %89 : vector<2x8xf32> to vector<2x8x1xf32>
    %91 = vector.broadcast %90 : vector<2x8x1xf32> to vector<2x8x8xf32>
    %92 = arith.divf %88, %91 : vector<2x8x8xf32>
    %93 = arith.truncf %92 : vector<2x8x8xf32> to vector<2x8x8xbf16>
    "tpu.trace_start"() <{level = 10 : i32, message = "bqk,bkd->bqd"}> : () -> ()
    %cst_27 = arith.constant dense<0.000000e+00> : vector<2x8x8xf32>
    %94 = tpu.matmul %93, %78, %cst_27 {dimension_numbers = #tpu.dot_dimension_numbers<[2], [1], [1], [2], [0, 0, 0, 1, 1, 2], [0], [0]>} : vector<2x8x8xbf16>, vector<2x8x8xbf16>, vector<2x8x8xf32> -> vector<2x8x8xf32>
    "tpu.trace_stop"() : () -> ()
    %95 = vector.shape_cast %94 : vector<2x8x8xf32> to vector<16x8xf32>
    %96 = vector.extract_strided_slice %43 {offsets = [0, 16], sizes = [16, 8], strides = [1, 1]} : vector<16x32xbf16> to vector<16x8xbf16>
    %97 = vector.shape_cast %96 : vector<16x8xbf16> to vector<2x8x8xbf16>
    %98 = vector.extract_strided_slice %44 {offsets = [0, 16], sizes = [16, 8], strides = [1, 1]} : vector<16x32xbf16> to vector<16x8xbf16>
    %99 = vector.shape_cast %98 : vector<16x8xbf16> to vector<2x8x8xbf16>
    %100 = vector.extract_strided_slice %45 {offsets = [0, 16], sizes = [16, 8], strides = [1, 1]} : vector<16x32xbf16> to vector<16x8xbf16>
    %101 = vector.shape_cast %100 : vector<16x8xbf16> to vector<2x8x8xbf16>
    "tpu.trace_start"() <{level = 10 : i32, message = "bqd,bkd->bqk"}> : () -> ()
    %cst_28 = arith.constant dense<0.000000e+00> : vector<2x8x8xf32>
    %102 = tpu.matmul %97, %99, %cst_28 {dimension_numbers = #tpu.dot_dimension_numbers<[2], [2], [1], [1], [0, 0, 0, 1, 1, 1], [0], [0]>} : vector<2x8x8xbf16>, vector<2x8x8xbf16>, vector<2x8x8xf32> -> vector<2x8x8xf32>
    %cst_29 = arith.constant -1.000000e+30 : f32
    "tpu.trace_stop"() : () -> ()
    %103 = vector.shape_cast %49 : vector<1x8x8xi1> to vector<1x8x8xi1>
    %104 = vector.broadcast %103 : vector<1x8x8xi1> to vector<2x8x8xi1>
    %105 = vector.broadcast %cst_29 : f32 to vector<2x8x8xf32>
    %106 = arith.select %104, %102, %105 : vector<2x8x8xi1>, vector<2x8x8xf32>
    %cst_30 = arith.constant dense<0xFF800000> : vector<2x8xf32>
    %107 = vector.multi_reduction <maximumf>, %106, %cst_30 [2] : vector<2x8x8xf32> to vector<2x8xf32>
    %108 = vector.shape_cast %107 : vector<2x8xf32> to vector<2x8x1xf32>
    %109 = vector.broadcast %108 : vector<2x8x1xf32> to vector<2x8x8xf32>
    %110 = arith.subf %106, %109 : vector<2x8x8xf32>
    %111 = math.exp %110 : vector<2x8x8xf32>
    %cst_31 = arith.constant dense<0.000000e+00> : vector<2x8xf32>
    %112 = vector.multi_reduction <add>, %111, %cst_31 [2] : vector<2x8x8xf32> to vector<2x8xf32>
    %113 = vector.shape_cast %112 : vector<2x8xf32> to vector<2x8x1xf32>
    %114 = vector.broadcast %113 : vector<2x8x1xf32> to vector<2x8x8xf32>
    %115 = arith.divf %111, %114 : vector<2x8x8xf32>
    %116 = arith.truncf %115 : vector<2x8x8xf32> to vector<2x8x8xbf16>
    "tpu.trace_start"() <{level = 10 : i32, message = "bqk,bkd->bqd"}> : () -> ()
    %cst_32 = arith.constant dense<0.000000e+00> : vector<2x8x8xf32>
    %117 = tpu.matmul %116, %101, %cst_32 {dimension_numbers = #tpu.dot_dimension_numbers<[2], [1], [1], [2], [0, 0, 0, 1, 1, 2], [0], [0]>} : vector<2x8x8xbf16>, vector<2x8x8xbf16>, vector<2x8x8xf32> -> vector<2x8x8xf32>
    "tpu.trace_stop"() : () -> ()
    %118 = vector.shape_cast %117 : vector<2x8x8xf32> to vector<16x8xf32>
    %119 = vector.extract_strided_slice %43 {offsets = [0, 24], sizes = [16, 8], strides = [1, 1]} : vector<16x32xbf16> to vector<16x8xbf16>
    %120 = vector.shape_cast %119 : vector<16x8xbf16> to vector<2x8x8xbf16>
    %121 = vector.extract_strided_slice %44 {offsets = [0, 24], sizes = [16, 8], strides = [1, 1]} : vector<16x32xbf16> to vector<16x8xbf16>
    %122 = vector.shape_cast %121 : vector<16x8xbf16> to vector<2x8x8xbf16>
    %123 = vector.extract_strided_slice %45 {offsets = [0, 24], sizes = [16, 8], strides = [1, 1]} : vector<16x32xbf16> to vector<16x8xbf16>
    %124 = vector.shape_cast %123 : vector<16x8xbf16> to vector<2x8x8xbf16>
    "tpu.trace_start"() <{level = 10 : i32, message = "bqd,bkd->bqk"}> : () -> ()
    %cst_33 = arith.constant dense<0.000000e+00> : vector<2x8x8xf32>
    %125 = tpu.matmul %120, %122, %cst_33 {dimension_numbers = #tpu.dot_dimension_numbers<[2], [2], [1], [1], [0, 0, 0, 1, 1, 1], [0], [0]>} : vector<2x8x8xbf16>, vector<2x8x8xbf16>, vector<2x8x8xf32> -> vector<2x8x8xf32>
    %cst_34 = arith.constant -1.000000e+30 : f32
    "tpu.trace_stop"() : () -> ()
    %126 = vector.shape_cast %49 : vector<1x8x8xi1> to vector<1x8x8xi1>
    %127 = vector.broadcast %126 : vector<1x8x8xi1> to vector<2x8x8xi1>
    %128 = vector.broadcast %cst_34 : f32 to vector<2x8x8xf32>
    %129 = arith.select %127, %125, %128 : vector<2x8x8xi1>, vector<2x8x8xf32>
    %cst_35 = arith.constant dense<0xFF800000> : vector<2x8xf32>
    %130 = vector.multi_reduction <maximumf>, %129, %cst_35 [2] : vector<2x8x8xf32> to vector<2x8xf32>
    %131 = vector.shape_cast %130 : vector<2x8xf32> to vector<2x8x1xf32>
    %132 = vector.broadcast %131 : vector<2x8x1xf32> to vector<2x8x8xf32>
    %133 = arith.subf %129, %132 : vector<2x8x8xf32>
    %134 = math.exp %133 : vector<2x8x8xf32>
    %cst_36 = arith.constant dense<0.000000e+00> : vector<2x8xf32>
    %135 = vector.multi_reduction <add>, %134, %cst_36 [2] : vector<2x8x8xf32> to vector<2x8xf32>
    %136 = vector.shape_cast %135 : vector<2x8xf32> to vector<2x8x1xf32>
    %137 = vector.broadcast %136 : vector<2x8x1xf32> to vector<2x8x8xf32>
    %138 = arith.divf %134, %137 : vector<2x8x8xf32>
    %139 = arith.truncf %138 : vector<2x8x8xf32> to vector<2x8x8xbf16>
    "tpu.trace_start"() <{level = 10 : i32, message = "bqk,bkd->bqd"}> : () -> ()
    %cst_37 = arith.constant dense<0.000000e+00> : vector<2x8x8xf32>
    %140 = tpu.matmul %139, %124, %cst_37 {dimension_numbers = #tpu.dot_dimension_numbers<[2], [1], [1], [2], [0, 0, 0, 1, 1, 2], [0], [0]>} : vector<2x8x8xbf16>, vector<2x8x8xbf16>, vector<2x8x8xf32> -> vector<2x8x8xf32>
    "tpu.trace_stop"() : () -> ()
    %141 = vector.shape_cast %140 : vector<2x8x8xf32> to vector<16x8xf32>
    %142 = tpu.concatenate %72, %95, %118, %141 in 1 : vector<16x8xf32>, vector<16x8xf32>, vector<16x8xf32>, vector<16x8xf32> -> vector<16x32xf32>
    %143 = arith.truncf %142 : vector<16x32xf32> to vector<16x32xbf16>
    %c0_38 = arith.constant 0 : index
    %c0_39 = arith.constant 0 : index
    %c0_40 = arith.constant 0 : index
    %144 = vector.load %arg5[%c0_38, %c0_39, %c0_40] : memref<1x32x32xbf16, #tpu.memory_space<vmem>>, vector<1x32x32xbf16>
    %145 = vector.shape_cast %144 : vector<1x32x32xbf16> to vector<32x32xbf16>
    %cst_41 = arith.constant dense<0.000000e+00> : vector<16x32xf32>
    %146 = tpu.matmul %143, %145, %cst_41 {dimension_numbers = #tpu.dot_dimension_numbers<[1], [0], [0], [1], [0, 0, 1, 1], [], []>} : vector<16x32xbf16>, vector<32x32xbf16>, vector<16x32xf32> -> vector<16x32xf32>
    %c0_42 = arith.constant 0 : index
    %c0_43 = arith.constant 0 : index
    %c0_44 = arith.constant 0 : index
    %147 = vector.load %arg6[%c0_42, %c0_43, %c0_44] : memref<1x32x128xbf16, #tpu.memory_space<vmem>>, vector<1x32x128xbf16>
    %148 = vector.shape_cast %147 : vector<1x32x128xbf16> to vector<32x128xbf16>
    %cst_45 = arith.constant dense<0.000000e+00> : vector<16x128xf32>
    %149 = tpu.matmul %24, %148, %cst_45 {dimension_numbers = #tpu.dot_dimension_numbers<[1], [0], [0], [1], [0, 0, 1, 1], [], []>} : vector<16x32xbf16>, vector<32x128xbf16>, vector<16x128xf32> -> vector<16x128xf32>
    %150 = vector.extract_strided_slice %149 {offsets = [0, 0], sizes = [16, 64], strides = [1, 1]} : vector<16x128xf32> to vector<16x64xf32>
    %151 = vector.extract_strided_slice %149 {offsets = [0, 64], sizes = [16, 64], strides = [1, 1]} : vector<16x128xf32> to vector<16x64xf32>
    %cst_46 = arith.constant 0.000000e+00 : f32
    %152 = vector.broadcast %cst_46 : f32 to vector<16x64xf32>
    %153 = arith.subf %152, %150 : vector<16x64xf32>
    %154 = math.exp %153 : vector<16x64xf32>
    %cst_47 = arith.constant 1.000000e+00 : f32
    %155 = vector.broadcast %cst_47 : f32 to vector<16x64xf32>
    %156 = arith.addf %155, %154 : vector<16x64xf32>
    %157 = arith.divf %150, %156 : vector<16x64xf32>
    %158 = arith.mulf %157, %151 : vector<16x64xf32>
    %159 = arith.truncf %158 : vector<16x64xf32> to vector<16x64xbf16>
    %c0_48 = arith.constant 0 : index
    %c0_49 = arith.constant 0 : index
    %c0_50 = arith.constant 0 : index
    %160 = vector.load %arg7[%c0_48, %c0_49, %c0_50] : memref<1x64x32xbf16, #tpu.memory_space<vmem>>, vector<1x64x32xbf16>
    %161 = vector.shape_cast %160 : vector<1x64x32xbf16> to vector<64x32xbf16>
    %cst_51 = arith.constant dense<0.000000e+00> : vector<16x32xf32>
    %162 = tpu.matmul %159, %161, %cst_51 {dimension_numbers = #tpu.dot_dimension_numbers<[1], [0], [0], [1], [0, 0, 1, 1], [], []>} : vector<16x64xbf16>, vector<64x32xbf16>, vector<16x32xf32> -> vector<16x32xf32>
    %163 = arith.addf %3, %146 : vector<16x32xf32>
    %164 = arith.addf %163, %162 : vector<16x32xf32>
    %c0_52 = arith.constant 0 : index
    %c0_53 = arith.constant 0 : index
    %165 = vector.load %arg11[%c0_52, %c0_53] : memref<16x32xf32, #tpu.memory_space<vmem>>, vector<16x32xf32>
    tpu.vector_store %arg11[%c0_52, %c0_53], %164 {strides = array<i32>} : memref<16x32xf32, #tpu.memory_space<vmem>>, vector<16x32xf32>,
    %c1_i32 = arith.constant 1 : i32
    %166 = arith.cmpi eq, %arg0, %c1_i32 : i32
    %167 = arith.extui %166 : i1 to i32
    %c0_i32_54 = arith.constant 0 : i32
    %168 = arith.cmpi ne, %167, %c0_i32_54 : i32
    scf.if %168 {
      %c0_55 = arith.constant 0 : index
      %c0_56 = arith.constant 0 : index
      %169 = vector.load %arg9[%c0_55, %c0_56] : memref<1x32xf32, #tpu.memory_space<vmem>>, vector<1x32xf32>
      %cst_57 = arith.constant dense<0.000000e+00> : vector<16xf32>
      %170 = vector.multi_reduction <add>, %164, %cst_57 [1] : vector<16x32xf32> to vector<16xf32>
      %171 = vector.shape_cast %170 : vector<16xf32> to vector<16x1xf32>
      %cst_58 = arith.constant 3.200000e+01 : f32
      %172 = vector.broadcast %cst_58 : f32 to vector<16x1xf32>
      %173 = arith.divf %171, %172 : vector<16x1xf32>
      %174 = vector.broadcast %173 : vector<16x1xf32> to vector<16x32xf32>
      %175 = arith.subf %164, %174 : vector<16x32xf32>
      %176 = arith.mulf %175, %175 : vector<16x32xf32>
      %cst_59 = arith.constant dense<0.000000e+00> : vector<16xf32>
      %177 = vector.multi_reduction <add>, %176, %cst_59 [1] : vector<16x32xf32> to vector<16xf32>
      %178 = vector.shape_cast %177 : vector<16xf32> to vector<16x1xf32>
      %cst_60 = arith.constant 3.200000e+01 : f32
      %179 = vector.broadcast %cst_60 : f32 to vector<16x1xf32>
      %180 = arith.divf %178, %179 : vector<16x1xf32>
      %cst_61 = arith.constant 9.99999974E-6 : f32
      %181 = vector.broadcast %cst_61 : f32 to vector<16x1xf32>
      %182 = arith.addf %180, %181 : vector<16x1xf32>
      %183 = math.rsqrt %182 : vector<16x1xf32>
      %184 = vector.broadcast %183 : vector<16x1xf32> to vector<16x32xf32>
      %185 = arith.mulf %175, %184 : vector<16x32xf32>
      %186 = vector.broadcast %169 : vector<1x32xf32> to vector<16x32xf32>
      %187 = arith.mulf %185, %186 : vector<16x32xf32>
      %c0_62 = arith.constant 0 : index
      %c0_63 = arith.constant 0 : index
      %188 = vector.load %arg10[%c0_62, %c0_63] : memref<16x32xf32, #tpu.memory_space<vmem>>, vector<16x32xf32>
      tpu.vector_store %arg10[%c0_62, %c0_63], %187 {strides = array<i32>} : memref<16x32xf32, #tpu.memory_space<vmem>>, vector<16x32xf32>,
    } else {
    }
    return
  }
  func.func @transform_0(%arg0: i32, %arg1: memref<16xi32, #tpu.memory_space<smem>>) -> (i32, i32) {
    %c0_i32 = arith.constant 0 : i32
    %c0_i32_0 = arith.constant 0 : i32
    %c0_i32_1 = arith.constant 0 : i32
    return %c0_i32, %c0_i32_0 : i32, i32
  }
  func.func @transform_1(%arg0: i32, %arg1: memref<16xi32, #tpu.memory_space<smem>>) -> (i32, i32, i32) {
    %c0_i32 = arith.constant 0 : i32
    %c0_i32_0 = arith.constant 0 : i32
    %c0_i32_1 = arith.constant 0 : i32
    return %arg0, %c0_i32, %c0_i32_0 : i32, i32, i32
  }
  func.func @transform_2(%arg0: i32, %arg1: memref<16xi32, #tpu.memory_space<smem>>) -> (i32, i32, i32) {
    %c0_i32 = arith.constant 0 : i32
    %c0_i32_0 = arith.constant 0 : i32
    %c0_i32_1 = arith.constant 0 : i32
    return %arg0, %c0_i32, %c0_i32_0 : i32, i32, i32
  }
  func.func @transform_3(%arg0: i32, %arg1: memref<16xi32, #tpu.memory_space<smem>>) -> (i32, i32, i32) {
    %c0_i32 = arith.constant 0 : i32
    %c0_i32_0 = arith.constant 0 : i32
    %c0_i32_1 = arith.constant 0 : i32
    return %arg0, %c0_i32, %c0_i32_0 : i32, i32, i32
  }
  func.func @transform_4(%arg0: i32, %arg1: memref<16xi32, #tpu.memory_space<smem>>) -> (i32, i32, i32) {
    %c0_i32 = arith.constant 0 : i32
    %c0_i32_0 = arith.constant 0 : i32
    %c0_i32_1 = arith.constant 0 : i32
    return %arg0, %c0_i32, %c0_i32_0 : i32, i32, i32
  }
  func.func @transform_5(%arg0: i32, %arg1: memref<16xi32, #tpu.memory_space<smem>>) -> (i32, i32, i32) {
    %c0_i32 = arith.constant 0 : i32
    %c0_i32_0 = arith.constant 0 : i32
    %c0_i32_1 = arith.constant 0 : i32
    return %arg0, %c0_i32, %c0_i32_0 : i32, i32, i32
  }
  func.func @transform_6(%arg0: i32, %arg1: memref<16xi32, #tpu.memory_space<smem>>) -> (i32, i32, i32) {
    %c0_i32 = arith.constant 0 : i32
    %c0_i32_0 = arith.constant 0 : i32
    %c0_i32_1 = arith.constant 0 : i32
    %c0_i32_2 = arith.constant 0 : i32
    return %c0_i32, %c0_i32_0, %c0_i32_1 : i32, i32, i32
  }
  func.func @transform_7(%arg0: i32, %arg1: memref<16xi32, #tpu.memory_space<smem>>) -> (i32, i32) {
    %c0_i32 = arith.constant 0 : i32
    %c0_i32_0 = arith.constant 0 : i32
    %c0_i32_1 = arith.constant 0 : i32
    return %c0_i32, %c0_i32_0 : i32, i32
  }
  func.func @transform_8(%arg0: i32, %arg1: memref<16xi32, #tpu.memory_space<smem>>) -> (i32, i32) {
    %c0_i32 = arith.constant 0 : i32
    %c0_i32_0 = arith.constant 0 : i32
    %c0_i32_1 = arith.constant 0 : i32
    return %c0_i32, %c0_i32_0 : i32, i32
  }
}

</mosaic_0001>

<bundles_post_ra>
// kernel: tpu_custom_call.1
= control target key start
LH: loop header
LB: loop body
LE: loop exit
PB: predicated region body
PF: predicated region fallthrough
CT: control target
= control target key end

     0   :  { %s2704_s0 = inlined_call_operand.hbm [shape: s32[16], index: 0, kind: input, shape index: {}]   ;;  %s2705_s1 = inlined_call_operand.vmem [shape: f32[64,32], index: 1, kind: input, shape index: {}]   ;;  %s2706_s2 = inlined_call_operand.vmem [shape: f32[2,1,32], index: 2, kind: input, shape index: {}]   ;;  %s2707_s3 = inlined_call_operand.vmem [shape: bf16[2,32,160], index: 3, kind: input, shape index: {}]   ;;  %s2708_s4 = inlined_call_operand.vmem [shape: bf16[2,32,32], index: 4, kind: input, shape index: {}]   ;;  %s2709_s5 = inlined_call_operand.vmem [shape: bf16[2,32,128], index: 5, kind: input, shape index: {}]   ;;  %s2710_s6 = inlined_call_operand.vmem [shape: bf16[2,64,32], index: 6, kind: input, shape index: {}]   ;;  %s2711_s7 = inlined_call_operand.vmem [shape: f32[2,16,32], index: 7, kind: input, shape index: {}]   ;;  %s2712_s8 = inlined_call_operand.vmem [shape: f32[1,32], index: 8, kind: input, shape index: {}]   ;;  %s2713_s9 = inlined_call_operand.hbm [shape: f32[16,32], index: 9, kind: output, shape index: {}]  }
   0x1   :  { %s2220_s11 = scalar_lea.hbm %s2704_s0, 16 }
   0x2   :  { %p2221_p0 = scmp.ne.s32.totalorder %s2704_s0, %s2220_s11  ;;  %p2224_p1 = scmp.lt.u32.totalorder %s2220_s11, %s2704_s0 }
   0x4   :  { %p2226_p2 = pnand %p2224_p1, %p2221_p0 }
   0x6   :  { %2229 = shalt.err (!%p2226_p2)  }
   0x7   :  { %s2278_s16 = smov [#allocation4]  }
   0x8   :  { %15 = dma.hbm_to_smem %s2704_s0, 16, %s2278_s16, [#allocation3] }
   0x9   :  { %2264 = dma.done.wait [#allocation3], 16 }
   0xa   :  { %2265 = vsyncadd [#allocation3], 4294967280 }
   0xb   :  { %17 = sfence }
   0xc   :  { %18 = vsyncpa [#allocation6], 0  ;;  %s2361_s19 = smov 0  }
   0xd LB: > { %s2367_s20 = sadd.s32 4294967295, %s2272_s19   ;;  %p1858_p3 = scmp.ge.s32.totalorder %s2272_s19, 1  ;;  %s2272_s19 = sphi %s2361_s19, %s24_s19  }
   0xe   : > { %p301_p4 = scmp.lt.s32.totalorder %s2272_s19, 3 }
  0x10   : > { %p302_p5 = pnand %p1858_p3, %p301_p4 }
  0x11   : > { %p348_p6 = scmp.lt.s32.totalorder (!%p302_p5), %s2367_s20, 1  ;;  %p1867_p7 = scmp.ne.s32.totalorder (!%p302_p5), %s2367_s20, 0 }
  0x12   : > { %305 = sbr.rel (%p302_p5) target bundleno = 3879 (0xf27), region = 52 }
  0x19   : > { %s2373_s0 = scalar_select %p348_p6, %s2367_s20, 1 }
  0x1a   : > { %375 = sbr.rel (%p1867_p7) target bundleno = 44 (0x2c), region = 56  ;;  %s2274_s17 = smov (!%p1867_p7), 0  }
  0x1b   : > { %s350_s23 = scalar_lea.vmem %s2706_s2, %s2373_s0  ;;  %s1915_s24 = sshll.u32 %s2373_s0, 5 }
  0x1c   : > { %s2383_s27 = scalar_lea.vmem %s2707_s3, %s1915_s24  ;;  %s1916_s28 = sshll.u32 %s2373_s0, 4 }
  0x1d   : > { %s2389_s10 = scalar_lea.vmem %s2708_s4, %s1916_s28  ;;  %s2394_s13 = scalar_lea.vmem %s2709_s5, %s1916_s28 }
  0x1e   : > { %s2399_s16 = scalar_lea.vmem %s2710_s6, %s1915_s24 }
  0x21 LB: >> { %s382_s18 = sld [smem:[#allocation4 + %s2276_s17]]  ;;  %vm386_vm0 = vcmask 253952   ;;  %s385_s26 = scalar_lea.vmem [#allocation2], %s2276_s17  ;;  %s2276_s17 = sphi %s2274_s17, %s381_s17  }
  0x22   : >> { %s381_s17 = sadd.s32 1, %s2276_s17  }
  0x23   : >> { %p378_p8 = scmp.ge.s32.totalorder %s381_s17, 16  }
  0x25   : > { %380 = sbr.rel (!%p378_p8) target bundleno = 33 (0x21), region = 109 }
  0x27   : >> { %s383_s25 = scalar_lea.vmem %s2705_s1, %s382_s18 }
  0x28   : >> { %v384_v0 = vld [vmem:[%s383_s25] sm:$0x1] }
  0x29   : >> { %387 = vst.msk [vmem:[%s385_s26] sm:$0x1] %vm386_vm0, %v384_v0 }
  0x2c PF: > { %vm391_vm1 = vcmask 261120   ;;  %v2156_v15 = vld [vmem:[%s2383_s27 + $0x4] ss:$8 sps:$4 sm:$0xff]   ;;  %v2158_v16 = vld [vmem:[%s2383_s27] ss:$8 sps:$4 sm:$0xff]   ;;  %v2279_v18 = vmov 0  }
  0x2d   : > { %v2159_v17 = vld [vmem:[%s2383_s27 + $0x14] ss:$8 sps:$4 sm:$0xff]   ;;  %455 = vmatprep.subr.bf16.mxu0 %v2156_v15  ;;  %487 = vmatprep.mubr.bf16.mxu0 %v2279_v18  ;;  %v2161_v19 = vld [vmem:[%s2383_s27 + $0x10] ss:$8 sps:$4 sm:$0xff]   ;;  %v2416_v20 = vld [vmem:[%s2711_s7] sm:$0xff]  ;;  %s2280_s11 = smov 32  }
  0x2e   : > { %456 = vmatpush1.bf16.msra.mxu0 %v2158_v16  ;;  %v2421_v21 = vld [vmem:[%s2711_s7 + $0x8] sm:$0xff]  ;;  %v1874_v22 = vld [vmem:[%s2711_s7 + $0x10] sm:$0xff]  ;;  %s2281_s14 = smov 96   ;;  %v1868_v32 = vld [vmem:[%s350_s23] ss:$0 sm:$0xff]  ;;  %v2282_v44 = vmov 0.0  }
  0x2f   : > { %457 = vmatprep.subr.bf16.mxu0 %v2159_v17  ;;  %v1875_v42 = vld [vmem:[%s2711_s7 + $0x18] sm:$0xff]  ;;  %1968 = vmatprep.subr.bf16.mxu1 %v2282_v44  ;;  %vm2283_vm2 = vmmov 0   ;;  %vm569_vm3 = vcmask 64512   ;;  %s2284_s0 = smov 64   ;;  %s2285_s23 = smov 88   ;;  %vm699_vm5 = vcmask 1043456  }
  0x30   : > { %v388_v1 = vld [vmem:[#allocation2] sm:$0xff]  ;;  %v389_v2 = vld [vmem:[#allocation2 + $0x8] sm:$0xff]  ;;  %1970 = vmatprep.mubr.msk.bf16.mxu1 %vm2283_vm2, %v2282_v44  ;;  %s2286_s22 = smov 120   ;;  %s2287_s25 = smov 56   ;;  %vm1484_vm6 = vcmask 130048   ;;  %vm1487_vm7 = vcmask 195584  }
  0x31   : > { %v392_v3 = vsel %vm391_vm1, %v388_v1, 0.0  ;;  %v395_v4 = vsel %vm391_vm1, %v389_v2, 0.0  ;;  %s2288_s26 = smov 80   ;;  %s2289_s24 = smov 112   ;;  %vm1663_vm8 = vcmask 523264  }
  0x32   : > { %393 = vadd.xlane.f32.xlu0 %v392_v3  ;;  %458 = vmatpush1.bf16.msra.mxu0 %v2161_v19  ;;  %s2290_s28 = smov 48   ;;  %s2291_s29 = smov 72  }
  0x33   : > { %1974 = vmatprep.subr.bf16.mxu0 %v2282_v44  ;;  %s2292_s30 = smov 104   ;;  %s2294_s27 = smov 8  }
  0x34   : > { %s2295_s12 = smov 16   ;;  %p1909_p9 = scmp.ne.s32.totalorder %s2367_s20, 1 }
  0x36   : > { %396 = vadd.xlane.f32.xlu0 %v395_v4 }
  0x4c   : > { %527 = vrot.lane.b32.xlu0 %v2416_v20, %s2280_s11 }
  0x50   : > { %507 = vrot.lane.b32.xlu0 %v1874_v22, %s2281_s14 }
  0xbf   : > { %v394_v5 = vpop.xlane.xlu0 %393 }
  0xc0   : > { %v399_v6 = vmul.f32 0.03125, %v394_v5 }
  0xc2   : > { %v401_v7 = vsub.f32 %v388_v1, %v399_v6 }
  0xc3   : > { %v397_v8 = vpop.xlane.xlu0 %396 }
  0xc4   : > { %v400_v9 = vmul.f32 0.03125, %v397_v8  ;;  %v403_v10 = vmul.f32 %v401_v7, %v401_v7 }
  0xc6   : > { %v402_v11 = vsub.f32 %v389_v2, %v400_v9  ;;  %v405_v12 = vsel %vm391_vm1, %v403_v10, 0.0 }
  0xc7   : > { %406 = vadd.xlane.f32.xlu1 %v405_v12  ;;  %v528_v46 = vpop.permute.xlu0 %527 }
  0xc8   : > { %v404_v13 = vmul.f32 %v402_v11, %v402_v11 }
  0xca   : > { %v408_v14 = vsel %vm391_vm1, %v404_v13, 0.0 }
  0xcb   : > { %409 = vadd.xlane.f32.xlu1 %v408_v14  ;;  %v508_v52 = vpop.permute.xlu0 %507 }
  0xdc   : > { %529 = vrot.lane.b32.xlu1 %v2421_v21, %s2280_s11 }
 0x154   : > { %v407_v23 = vpop.xlane.xlu1 %406 }
 0x155   : > { %v411_v24 = vmul.f32 0.03125, %v407_v23 }
 0x157   : > { %v413_v25 = vadd.f32 1e-05, %v411_v24 }
 0x158   : > { %v410_v26 = vpop.xlane.xlu1 %409 }
 0x159   : > { %2170 = vrsqrt.f32 %v413_v25  ;;  %v412_v27 = vmul.f32 0.03125, %v410_v26 }
 0x15b   : > { %v414_v28 = vadd.f32 1e-05, %v412_v27 }
 0x15c   : > { %v530_v45 = vpop.permute.xlu1 %529 }
 0x15d   : > { %2172 = vrsqrt.f32 %v414_v28 }
 0x163   : > { %v2171_v29 = vpop.eup %2170 }
 0x164   : > { %v417_v30 = vmul.f32 %v2171_v29, %v401_v7  ;;  %v550_v7 = vlaneseq }
 0x166   : > { %v425_v34 = vmul.f32 %v1868_v32, %v417_v30  ;;  %v551_v8 = vshrl.u32 %v550_v7, 7  ;;  %v553_v9 = vand.u32 127, %v550_v7 }
 0x167   : > { %v2173_v31 = vpop.eup %2172 }
 0x168   : > { %v418_v33 = vmul.f32 %v2173_v31, %v402_v11  ;;  %vm2490_vm4 = vcmp.le.s32.totalorder %v553_v9, %v551_v8 }
 0x16a   : > { %v426_v35 = vmul.f32 %v1868_v32, %v418_v33 }
 0x16c   : > { %v2436_v36 = vpack.c.bf16 %v426_v35, %v425_v34 }
 0x16e   : > { %1873 = vmatmul.mubr.msk.bf16.vlgmr.msra.gmra.mrb[0].mxu0 %vm391_vm1, %v2436_v36 }
 0x16f   : > { %1976 = vmatprep.mubr.msk.bf16.mxu0 %vm2283_vm2, %v2282_v44 }
 0x241   : > { %v2440_v37 = vpop.f32.mrb[0].mxu0 }
 0x242   : > { %v491_v38 = vpop.f32.mrb[1].mxu0  ;;  %v533_v47 = vmul.f32 %v528_v46, %v2440_v37  ;;  %v513_v55 = vmul.f32 %v508_v52, %v2440_v37  ;;  %v503_v61 = vmul.f32 %v2416_v20, %v2440_v37 }
 0x243   : > { %v535_v39 = vmul.f32 %v1874_v22, %v491_v38  ;;  %v2442_v40 = vpop.f32.mrb[2].mxu0  ;;  %v2515_v38 = vpack.c.bf16 %v2440_v37, %v2440_v37 }
 0x244   : > { %v495_v41 = vpop.f32.mrb[3].mxu0  ;;  %v534_v50 = vmul.f32 %v530_v45, %v2442_v40  ;;  %v504_v3 = vmul.f32 %v2421_v21, %v2442_v40  ;;  %v2502_v23 = vpack.c.bf16 %v2442_v40, %v2442_v40 }
 0x245   : > { %539 = vrot.lane.b32.xlu1 %v535_v39, %s2280_s11  ;;  %v536_v43 = vmul.f32 %v1875_v42, %v495_v41 }
 0x249   : > { %541 = vrot.lane.b32.xlu1 %v536_v43, %s2280_s11 }
 0x24d   : > { %509 = vrot.lane.b32.xlu1 %v1875_v42, %s2281_s14 }
 0x2b7   : > { %v540_v48 = vpop.permute.xlu1 %539 }
 0x2b8   : > { %v545_v49 = vadd.f32 %v540_v48, %v533_v47 }
 0x2ba   : > { %v2458_v51 = vpack.c.bf16 %v545_v49, %v545_v49 }
 0x2bb   : > { %v542_v53 = vpop.permute.xlu1 %541 }
 0x2bc   : > { %v546_v54 = vadd.f32 %v542_v53, %v534_v50  ;;  %567 = vrot.lane.b32.xlu0 %v2458_v51, %s2281_s14 }
 0x2be   : > { %v2463_v56 = vpack.c.bf16 %v546_v54, %v546_v54 }
 0x2bf   : > { %v510_v57 = vpop.permute.xlu1 %509 }
 0x2c0   : > { %617 = vrot.lane.b32.xlu1 %v2463_v56, %s2281_s14  ;;  %517 = vrot.lane.b32.xlu0 %v513_v55, %s2280_s11  ;;  %v514_v58 = vmul.f32 %v510_v57, %v2442_v40 }
 0x2c4   : > { %519 = vrot.lane.b32.xlu1 %v514_v58, %s2280_s11  ;;  %s2293_s11 = smov 40  }
 0x32e   : > { %v568_v59 = vpop.permute.xlu0 %567 }
 0x32f   : > { %v574_v60 = vsel %vm569_vm3, %v568_v59, 0 }
 0x330   : > { %1969 = vmatpush3.bf16.xpose.msra.mxu1 %v574_v60 }
 0x331   : > { %1980 = vmatprep.subr.bf16.mxu1 %v2282_v44 }
 0x332   : > { %v618_v62 = vpop.permute.xlu1 %617  ;;  %v518_v63 = vpop.permute.xlu0 %517 }
 0x333   : > { %v623_v0 = vsel %vm569_vm3, %v618_v62, 0  ;;  %v523_v1 = vadd.f32 %v518_v63, %v503_v61 }
 0x334   : > { %1975 = vmatpush3.bf16.xpose.msra.mxu0 %v623_v0 }
 0x335   : > { %v2475_v2 = vpack.c.bf16 %v523_v1, %v523_v1  ;;  %1986 = vmatprep.subr.bf16.mxu0 %v2282_v44 }
 0x336   : > { %v520_v4 = vpop.permute.xlu1 %519 }
 0x337   : > { %v524_v5 = vadd.f32 %v520_v4, %v504_v3  ;;  %1971 = vmatmul.mubr.msk.bf16.vlgmr.msra.gmra.mrb[0].mxu1 %vm569_vm3, %v2475_v2 }
 0x338   : > { %1982 = vmatprep.mubr.msk.bf16.mxu1 %vm2283_vm2, %v2282_v44 }
 0x339   : > { %v2484_v6 = vpack.c.bf16 %v524_v5, %v524_v5 }
 0x33b   : > { %1977 = vmatmul.mubr.msk.bf16.vlgmr.msra.gmra.mrb[4].mxu0 %vm569_vm3, %v2484_v6 }
 0x33c   : > { %1988 = vmatprep.mubr.msk.bf16.mxu0 %vm2283_vm2, %v2282_v44 }
 0x40a   : > { %v610_v11 = vpop.f32.mrb[0].mxu1 }
 0x40b   : > { %v667_v12 = vsel %vm2490_vm4, %v610_v11, -1e+30  ;;  %v1972_v13 = vpop.f32.mrb[1].mxu1 }
 0x40c   : > { %v613_v14 = vpop.f32.mrb[2].mxu1  ;;  %v669_v15 = vsel %vm569_vm3, %v667_v12, -inf }
 0x40d   : > { %670 = vmax.xlane.f32.xlu0 %v669_v15  ;;  %v1973_v16 = vpop.f32.mrb[3].mxu1 }
 0x40e   : > { %v659_v17 = vpop.f32.mrb[4].mxu0 }
 0x40f   : > { %v668_v18 = vsel %vm2490_vm4, %v659_v17, -1e+30  ;;  %v1978_v19 = vpop.f32.mrb[5].mxu0 }
 0x410   : > { %v662_v20 = vpop.f32.mrb[6].mxu0  ;;  %v672_v21 = vsel %vm569_vm3, %v668_v18, -inf }
 0x411   : > { %673 = vmax.xlane.f32.xlu1 %v672_v21  ;;  %v1979_v22 = vpop.f32.mrb[7].mxu0 }
 0x422   : > { %744 = vrot.lane.b32.xlu1 %v2502_v23, %s2284_s0 }
 0x426   : > { %794 = vrot.lane.b32.xlu1 %v2458_v51, %s2285_s23 }
 0x42a   : > { %844 = vrot.lane.b32.xlu1 %v2463_v56, %s2285_s23 }
 0x42e   : > { %842 = vrot.lane.b32.xlu1 %v2484_v6, %s2286_s22 }
 0x49a   : > { %v671_v24 = vpop.xlane.xlu0 %670 }
 0x49b   : > { %v675_v25 = vsub.f32 %v667_v12, %v671_v24 }
 0x49d   : > { %v677_v26 = vmul.f32 1.442695, %v675_v25 }
 0x49e   : > { %v674_v27 = vpop.xlane.xlu1 %673 }
 0x49f   : > { %2174 = vpow2.f32 %v677_v26  ;;  %v676_v28 = vsub.f32 %v668_v18, %v674_v27 }
 0x4a1   : > { %v679_v29 = vmul.f32 1.442695, %v676_v28 }
 0x4a2   : > { %v745_v30 = vpop.permute.xlu1 %744 }
 0x4a3   : > { %2176 = vpow2.f32 %v679_v29  ;;  %v750_v31 = vsel %vm699_vm5, %v745_v30, 0 }
 0x4a4   : > { %1987 = vmatpush3.bf16.msra.mxu0 %v750_v31 }
 0x4a5   : > { %1998 = vmatprep.subr.bf16.mxu0 %v2282_v44 }
 0x4a6   : > { %v795_v45 = vpop.permute.xlu1 %794 }
 0x4a7   : > { %v800_v50 = vsel %vm569_vm3, %v795_v45, 0 }
 0x4a9   : > { %v2175_v32 = vpop.eup %2174 }
 0x4aa   : > { %v681_v33 = vsel %vm569_vm3, %v2175_v32, 0.0  ;;  %v845_v49 = vpop.permute.xlu1 %844 }
 0x4ab   : > { %682 = vadd.xlane.f32.xlu0 %v681_v33  ;;  %v850_v53 = vsel %vm569_vm3, %v845_v49, 0 }
 0x4ad   : > { %v2177_v34 = vpop.eup %2176 }
 0x4ae   : > { %v684_v35 = vsel %vm569_vm3, %v2177_v34, 0.0  ;;  %v843_v55 = vpop.permute.xlu1 %842 }
 0x4af   : > { %685 = vadd.xlane.f32.xlu0 %v684_v35 }
 0x4c5   : > { %694 = vrot.lane.b32.xlu0 %v2515_v38, %s2284_s0 }
 0x4c9   : > { %792 = vrot.lane.b32.xlu0 %v2475_v2, %s2286_s22 }
 0x538   : > { %v683_v39 = vpop.xlane.xlu0 %682 }
 0x539   : > { %2178 = vrcp.f32 %v683_v39 }
 0x53c   : > { %v686_v40 = vpop.xlane.xlu0 %685 }
 0x53d   : > { %2180 = vrcp.f32 %v686_v40 }
 0x540   : > { %v695_v41 = vpop.permute.xlu0 %694 }
 0x541   : > { %v701_v42 = vsel %vm699_vm5, %v695_v41, 0 }
 0x542   : > { %1981 = vmatpush3.bf16.msra.mxu1 %v701_v42 }
 0x543   : > { %v2179_v43 = vpop.eup %2178  ;;  %1992 = vmatprep.subr.bf16.mxu1 %v2282_v44 }
 0x544   : > { %v688_v46 = vmul.f32 %v2179_v43, %v2175_v32  ;;  %v793_v54 = vpop.permute.xlu0 %792 }
 0x546   : > { %v691_v37 = vpack.c.bf16 %v688_v46, %v688_v46 }
 0x547   : > { %v2181_v47 = vpop.eup %2180 }
 0x548   : > { %v690_v48 = vmul.f32 %v2181_v47, %v2177_v34  ;;  %1983 = vmatmul.mubr.msk.bf16.vlgmr.msra.gmra.mrb[4].mxu1 %vm569_vm3, %v691_v37 }
 0x549   : > { %1994 = vmatprep.mubr.msk.bf16.mxu1 %vm2283_vm2, %v2282_v44 }
 0x54a   : > { %v692_v52 = vpack.c.bf16 %v690_v48, %v690_v48 }
 0x54b   : > { %1993 = vmatpush3.bf16.xpose.msra.mxu1 %v800_v50 }
 0x54c   : > { %1989 = vmatmul.mubr.msk.bf16.vlgmr.msra.gmra.mrb[8].mxu0 %vm569_vm3, %v692_v52  ;;  %2004 = vmatprep.subr.bf16.mxu1 %v2282_v44 }
 0x54d   : > { %1999 = vmatpush3.bf16.xpose.msra.mxu0 %v850_v53  ;;  %2000 = vmatprep.mubr.msk.bf16.mxu0 %vm2283_vm2, %v2282_v44 }
 0x54e   : > { %2010 = vmatprep.subr.bf16.mxu0 %v2282_v44 }
 0x552   : > { %1995 = vmatmul.mubr.msk.bf16.vlgmr.msra.gmra.mrb[8].mxu1 %vm569_vm3, %v793_v54 }
 0x553   : > { %2006 = vmatprep.mubr.msk.bf16.mxu1 %vm2283_vm2, %v2282_v44 }
 0x554   : > { %2001 = vmatmul.mubr.msk.bf16.vlgmr.msra.gmra.mrb[12].mxu0 %vm569_vm3, %v843_v55 }
 0x555   : > { %2012 = vmatprep.mubr.msk.bf16.mxu0 %vm2283_vm2, %v2282_v44 }
 0x61b   : > { %v2538_v57 = vpop.f32.mrb[4].mxu1 }
 0x61c   : > { %v1984_v58 = vpop.f32.mrb[5].mxu1 }
 0x61d   : > { %v740_v59 = vpop.f32.mrb[6].mxu1 }
 0x61e   : > { %v1985_v60 = vpop.f32.mrb[7].mxu1 }
 0x61f   : > { %v2540_v61 = vpop.f32.mrb[8].mxu0 }
 0x620   : > { %v1990_v62 = vpop.f32.mrb[9].mxu0 }
 0x621   : > { %v789_v63 = vpop.f32.mrb[10].mxu0 }
 0x622   : > { %v1991_v0 = vpop.f32.mrb[11].mxu0 }
 0x625   : > { %v836_v1 = vpop.f32.mrb[8].mxu1 }
 0x626   : > { %v892_v3 = vsel %vm2490_vm4, %v836_v1, -1e+30  ;;  %v1996_v4 = vpop.f32.mrb[9].mxu1 }
 0x627   : > { %v839_v5 = vpop.f32.mrb[10].mxu1  ;;  %v886_v7 = vpop.f32.mrb[12].mxu0  ;;  %v894_v8 = vsel %vm569_vm3, %v892_v3, -inf }
 0x628   : > { %v893_v9 = vsel %vm2490_vm4, %v886_v7, -1e+30  ;;  %v2002_v11 = vpop.f32.mrb[13].mxu0  ;;  %895 = vmax.xlane.f32.xlu0 %v894_v8  ;;  %v1997_v12 = vpop.f32.mrb[11].mxu1 }
 0x629   : > { %v889_v13 = vpop.f32.mrb[14].mxu0  ;;  %v897_v14 = vsel %vm569_vm3, %v893_v9, -inf }
 0x62a   : > { %898 = vmax.xlane.f32.xlu1 %v897_v14  ;;  %v2003_v15 = vpop.f32.mrb[15].mxu0 }
 0x63b   : > { %966 = vrot.lane.b32.xlu1 %v2502_v23, %s2287_s25 }
 0x63f   : > { %1016 = vrot.lane.b32.xlu1 %v2458_v51, %s2288_s26 }
 0x643   : > { %1066 = vrot.lane.b32.xlu1 %v2463_v56, %s2288_s26 }
 0x647   : > { %1064 = vrot.lane.b32.xlu1 %v2484_v6, %s2289_s24 }
 0x6b5   : > { %v896_v16 = vpop.xlane.xlu0 %895 }
 0x6b6   : > { %v900_v17 = vsub.f32 %v892_v3, %v896_v16 }
 0x6b7   : > { %v899_v18 = vpop.xlane.xlu1 %898 }
 0x6b8   : > { %v902_v19 = vmul.f32 1.442695, %v900_v17  ;;  %v901_v20 = vsub.f32 %v893_v9, %v899_v18 }
 0x6ba   : > { %2182 = vpow2.f32 %v902_v19  ;;  %v904_v21 = vmul.f32 1.442695, %v901_v20 }
 0x6bb   : > { %v967_v22 = vpop.permute.xlu1 %966 }
 0x6bc   : > { %2184 = vpow2.f32 %v904_v21  ;;  %v972_v24 = vsel %vm699_vm5, %v967_v22, 0 }
 0x6bd   : > { %2011 = vmatpush3.bf16.msra.mxu0 %v972_v24 }
 0x6be   : > { %2022 = vmatprep.subr.bf16.mxu0 %v2282_v44 }
 0x6bf   : > { %v1017_v34 = vpop.permute.xlu1 %1016 }
 0x6c0   : > { %v1022_v43 = vsel %vm569_vm3, %v1017_v34, 0 }
 0x6c3   : > { %v1067_v42 = vpop.permute.xlu1 %1066 }
 0x6c4   : > { %v2183_v25 = vpop.eup %2182  ;;  %v1072_v46 = vsel %vm569_vm3, %v1067_v42, 0 }
 0x6c5   : > { %v906_v26 = vsel %vm569_vm3, %v2183_v25, 0.0 }
 0x6c6   : > { %v2185_v27 = vpop.eup %2184  ;;  %907 = vadd.xlane.f32.xlu0 %v906_v26 }
 0x6c7   : > { %v909_v28 = vsel %vm569_vm3, %v2185_v27, 0.0  ;;  %v1065_v47 = vpop.permute.xlu1 %1064 }
 0x6ca   : > { %910 = vadd.xlane.f32.xlu0 %v909_v28 }
 0x6e0   : > { %918 = vrot.lane.b32.xlu0 %v2515_v38, %s2287_s25 }
 0x6e4   : > { %1014 = vrot.lane.b32.xlu0 %v2475_v2, %s2289_s24 }
 0x753   : > { %v908_v29 = vpop.xlane.xlu0 %907 }
 0x754   : > { %2186 = vrcp.f32 %v908_v29 }
 0x757   : > { %v911_v30 = vpop.xlane.xlu0 %910 }
 0x758   : > { %2188 = vrcp.f32 %v911_v30 }
 0x75b   : > { %v919_v31 = vpop.permute.xlu0 %918 }
 0x75c   : > { %v924_v32 = vsel %vm699_vm5, %v919_v31, 0 }
 0x75d   : > { %2005 = vmatpush3.bf16.msra.mxu1 %v924_v32 }
 0x75e   : > { %v2187_v33 = vpop.eup %2186  ;;  %2016 = vmatprep.subr.bf16.mxu1 %v2282_v44 }
 0x75f   : > { %v913_v35 = vmul.f32 %v2187_v33, %v2183_v25  ;;  %v1015_v37 = vpop.permute.xlu0 %1014 }
 0x761   : > { %v916_v39 = vpack.c.bf16 %v913_v35, %v913_v35 }
 0x762   : > { %v2189_v40 = vpop.eup %2188 }
 0x763   : > { %v915_v41 = vmul.f32 %v2189_v40, %v2185_v27  ;;  %2007 = vmatmul.mubr.msk.bf16.vlgmr.msra.gmra.mrb[12].mxu1 %vm569_vm3, %v916_v39 }
 0x764   : > { %2018 = vmatprep.mubr.msk.bf16.mxu1 %vm2283_vm2, %v2282_v44 }
 0x765   : > { %v917_v45 = vpack.c.bf16 %v915_v41, %v915_v41 }
 0x766   : > { %2017 = vmatpush3.bf16.xpose.msra.mxu1 %v1022_v43 }
 0x767   : > { %2013 = vmatmul.mubr.msk.bf16.vlgmr.msra.gmra.mrb[16].mxu0 %vm569_vm3, %v917_v45  ;;  %2028 = vmatprep.subr.bf16.mxu1 %v2282_v44 }
 0x768   : > { %2023 = vmatpush3.bf16.xpose.msra.mxu0 %v1072_v46  ;;  %2024 = vmatprep.mubr.msk.bf16.mxu0 %vm2283_vm2, %v2282_v44 }
 0x769   : > { %2034 = vmatprep.subr.bf16.mxu0 %v2282_v44 }
 0x76d   : > { %2019 = vmatmul.mubr.msk.bf16.vlgmr.msra.gmra.mrb[16].mxu1 %vm569_vm3, %v1015_v37 }
 0x76e   : > { %2030 = vmatprep.mubr.msk.bf16.mxu1 %vm2283_vm2, %v2282_v44 }
 0x76f   : > { %2025 = vmatmul.mubr.msk.bf16.vlgmr.msra.gmra.mrb[20].mxu0 %vm569_vm3, %v1065_v47 }
 0x770   : > { %2036 = vmatprep.mubr.msk.bf16.mxu0 %vm2283_vm2, %v2282_v44 }
 0x836   : > { %v2576_v48 = vpop.f32.mrb[12].mxu1 }
 0x837   : > { %v2008_v49 = vpop.f32.mrb[13].mxu1 }
 0x838   : > { %v963_v50 = vpop.f32.mrb[14].mxu1 }
 0x839   : > { %v2009_v52 = vpop.f32.mrb[15].mxu1 }
 0x83a   : > { %v2578_v53 = vpop.f32.mrb[16].mxu0 }
 0x83b   : > { %v2141_v54 = vpack.i.bf16 %v2578_v53, %v2576_v48  ;;  %v2014_v55 = vpop.f32.mrb[17].mxu0 }
 0x83c   : > { %v1011_v58 = vpop.f32.mrb[18].mxu0 }
 0x83d   : > { %v2015_v59 = vpop.f32.mrb[19].mxu0 }
 0x840   : > { %v1058_v60 = vpop.f32.mrb[16].mxu1 }
 0x841   : > { %v1114_v62 = vsel %vm2490_vm4, %v1058_v60, -1e+30  ;;  %v2020_v63 = vpop.f32.mrb[17].mxu1 }
 0x842   : > { %v1061_v0 = vpop.f32.mrb[18].mxu1  ;;  %v1108_v1 = vpop.f32.mrb[20].mxu0  ;;  %v1116_v3 = vsel %vm569_vm3, %v1114_v62, -inf }
 0x843   : > { %v1115_v4 = vsel %vm2490_vm4, %v1108_v1, -1e+30  ;;  %v2026_v5 = vpop.f32.mrb[21].mxu0  ;;  %1117 = vmax.xlane.f32.xlu0 %v1116_v3  ;;  %v2021_v7 = vpop.f32.mrb[19].mxu1 }
 0x844   : > { %v1111_v8 = vpop.f32.mrb[22].mxu0  ;;  %v1119_v9 = vsel %vm569_vm3, %v1115_v4, -inf }
 0x845   : > { %1120 = vmax.xlane.f32.xlu1 %v1119_v9  ;;  %v2027_v11 = vpop.f32.mrb[23].mxu0 }
 0x856   : > { %1188 = vrot.lane.b32.xlu1 %v2502_v23, %s2290_s28 }
 0x85a   : > { %1238 = vrot.lane.b32.xlu1 %v2458_v51, %s2291_s29 }
 0x85e   : > { %1288 = vrot.lane.b32.xlu1 %v2463_v56, %s2291_s29 }
 0x862   : > { %1286 = vrot.lane.b32.xlu1 %v2484_v6, %s2292_s30 }
 0x8d0   : > { %v1118_v12 = vpop.xlane.xlu0 %1117 }
 0x8d1   : > { %v1122_v13 = vsub.f32 %v1114_v62, %v1118_v12 }
 0x8d2   : > { %v1121_v14 = vpop.xlane.xlu1 %1120 }
 0x8d3   : > { %v1124_v15 = vmul.f32 1.442695, %v1122_v13  ;;  %v1123_v16 = vsub.f32 %v1115_v4, %v1121_v14 }
 0x8d5   : > { %2190 = vpow2.f32 %v1124_v15  ;;  %v1126_v17 = vmul.f32 1.442695, %v1123_v16 }
 0x8d6   : > { %v1189_v18 = vpop.permute.xlu1 %1188 }
 0x8d7   : > { %2192 = vpow2.f32 %v1126_v17  ;;  %v1194_v19 = vsel %vm699_vm5, %v1189_v18, 0 }
 0x8d8   : > { %2035 = vmatpush3.bf16.msra.mxu0 %v1194_v19 }
 0x8d9   : > { %2046 = vmatprep.subr.bf16.mxu0 %v2282_v44 }
 0x8da   : > { %v1239_v27 = vpop.permute.xlu1 %1238 }
 0x8de   : > { %v1289_v32 = vpop.permute.xlu1 %1288 }
 0x8df   : > { %v2191_v51 = vpop.eup %2190  ;;  %v1294_v34 = vsel %vm569_vm3, %v1289_v32, 0 }
 0x8e0   : > { %v1128_v56 = vsel %vm569_vm3, %v2191_v51, 0.0 }
 0x8e1   : > { %v2193_v20 = vpop.eup %2192  ;;  %1129 = vadd.xlane.f32.xlu0 %v1128_v56 }
 0x8e2   : > { %v1131_v6 = vsel %vm569_vm3, %v2193_v20, 0.0  ;;  %v1287_v39 = vpop.permute.xlu1 %1286 }
 0x8e5   : > { %1132 = vadd.xlane.f32.xlu0 %v1131_v6 }
 0x8fb   : > { %1140 = vrot.lane.b32.xlu0 %v2515_v38, %s2290_s28 }
 0x8ff   : > { %1236 = vrot.lane.b32.xlu0 %v2475_v2, %s2292_s30  ;;  %v1244_v2 = vsel %vm569_vm3, %v1239_v27, 0 }
 0x96e   : > { %v1130_v21 = vpop.xlane.xlu0 %1129 }
 0x96f   : > { %2194 = vrcp.f32 %v1130_v21  ;;  %v2163_v21 = vld [vmem:[%s2394_s13 + $0x8] sm:$0xff]  }
 0x972   : > { %v1133_v22 = vpop.xlane.xlu0 %1132 }
 0x973   : > { %2196 = vrcp.f32 %v1133_v22  ;;  %v2164_v22 = vld [vmem:[%s2389_s10] sm:$0xff]  }
 0x976   : > { %v1141_v24 = vpop.permute.xlu0 %1140 }
 0x977   : > { %v1146_v25 = vsel %vm699_vm5, %v1141_v24, 0  ;;  %v2165_v24 = vld [vmem:[%s2389_s10 + $0x8] sm:$0xff]  }
 0x978   : > { %2029 = vmatpush3.bf16.msra.mxu1 %v1146_v25 }
 0x979   : > { %v2195_v26 = vpop.eup %2194  ;;  %2040 = vmatprep.subr.bf16.mxu1 %v2282_v44 }
 0x97a   : > { %v1135_v28 = vmul.f32 %v2195_v26, %v2191_v51  ;;  %v1237_v35 = vpop.permute.xlu0 %1236 }
 0x97c   : > { %v1138_v29 = vpack.c.bf16 %v1135_v28, %v1135_v28 }
 0x97d   : > { %v2197_v30 = vpop.eup %2196 }
 0x97e   : > { %v1137_v31 = vmul.f32 %v2197_v30, %v2193_v20  ;;  %2031 = vmatmul.mubr.msk.bf16.vlgmr.msra.gmra.mrb[20].mxu1 %vm569_vm3, %v1138_v29 }
 0x97f   : > { %2042 = vmatprep.mubr.msk.bf16.mxu1 %vm2283_vm2, %v2282_v44 }
 0x980   : > { %v1139_v33 = vpack.c.bf16 %v1137_v31, %v1137_v31 }
 0x981   : > { %2041 = vmatpush3.bf16.xpose.msra.mxu1 %v1244_v2 }
 0x982   : > { %2037 = vmatmul.mubr.msk.bf16.vlgmr.msra.gmra.mrb[24].mxu0 %vm569_vm3, %v1139_v33  ;;  %2052 = vmatprep.subr.bf16.mxu1 %v2282_v44 }
 0x983   : > { %2047 = vmatpush3.bf16.xpose.msra.mxu0 %v1294_v34  ;;  %2048 = vmatprep.mubr.msk.bf16.mxu0 %vm2283_vm2, %v2282_v44 }
 0x984   : > { %2058 = vmatprep.subr.bf16.mxu0 %v2282_v44 }
 0x988   : > { %2043 = vmatmul.mubr.msk.bf16.vlgmr.msra.gmra.mrb[24].mxu1 %vm569_vm3, %v1237_v35 }
 0x989   : > { %2054 = vmatprep.mubr.msk.bf16.mxu1 %vm2283_vm2, %v2282_v44 }
 0x98a   : > { %2049 = vmatmul.mubr.msk.bf16.vlgmr.msra.gmra.mrb[28].mxu0 %vm569_vm3, %v1287_v39 }
 0x98b   : > { %2060 = vmatprep.mubr.msk.bf16.mxu0 %vm2283_vm2, %v2282_v44 }
 0xa51   : > { %v1182_v40 = vpop.f32.mrb[20].mxu1 }
 0xa52   : > { %v2032_v41 = vpop.f32.mrb[21].mxu1 }
 0xa53   : > { %v1185_v42 = vpop.f32.mrb[22].mxu1 }
 0xa54   : > { %v2033_v43 = vpop.f32.mrb[23].mxu1 }
 0xa55   : > { %v1230_v45 = vpop.f32.mrb[24].mxu0 }
 0xa56   : > { %v2146_v46 = vpack.i.bf16 %v1230_v45, %v1182_v40  ;;  %v2038_v37 = vpop.f32.mrb[25].mxu0 }
 0xa57   : > { %v1233_v47 = vpop.f32.mrb[26].mxu0 }
 0xa58   : > { %v2039_v49 = vpop.f32.mrb[27].mxu0 }
 0xa5b   : > { %v1280_v50 = vpop.f32.mrb[24].mxu1 }
 0xa5c   : > { %v1336_v52 = vsel %vm2490_vm4, %v1280_v50, -1e+30  ;;  %v2044_v55 = vpop.f32.mrb[25].mxu1 }
 0xa5d   : > { %v1283_v58 = vpop.f32.mrb[26].mxu1  ;;  %v1330_v59 = vpop.f32.mrb[28].mxu0  ;;  %v1338_v60 = vsel %vm569_vm3, %v1336_v52, -inf }
 0xa5e   : > { %v1337_v62 = vsel %vm2490_vm4, %v1330_v59, -1e+30  ;;  %v2050_v63 = vpop.f32.mrb[29].mxu0  ;;  %1339 = vmax.xlane.f32.xlu0 %v1338_v60  ;;  %v2045_v0 = vpop.f32.mrb[27].mxu1 }
 0xa5f   : > { %v1333_v1 = vpop.f32.mrb[30].mxu0  ;;  %v1341_v3 = vsel %vm569_vm3, %v1337_v62, -inf }
 0xa60   : > { %1342 = vmax.xlane.f32.xlu1 %v1341_v3  ;;  %v2051_v4 = vpop.f32.mrb[31].mxu0 }
 0xa71   : > { %1410 = vrot.lane.b32.xlu1 %v2502_v23, %s2293_s11 }
 0xa75   : > { %2142 = vrot.lane.b32.xlu1 %v2141_v54, %s2294_s27 }
 0xa79   : > { %2147 = vrot.lane.b32.xlu1 %v2146_v46, %s2295_s12 }
 0xaeb   : > { %v1340_v10 = vpop.xlane.xlu0 %1339 }
 0xaec   : > { %v1344_v5 = vsub.f32 %v1336_v52, %v1340_v10 }
 0xaed   : > { %v1343_v7 = vpop.xlane.xlu1 %1342 }
 0xaee   : > { %v1346_v8 = vmul.f32 1.442695, %v1344_v5  ;;  %v1345_v9 = vsub.f32 %v1337_v62, %v1343_v7  ;;  %v2166_v7 = vld [vmem:[%s2399_s16] sm:$0xff]  }
 0xaf0   : > { %2198 = vpow2.f32 %v1346_v8  ;;  %v1348_v11 = vmul.f32 1.442695, %v1345_v9 }
 0xaf1   : > { %v1411_v12 = vpop.permute.xlu1 %1410 }
 0xaf2   : > { %2200 = vpow2.f32 %v1348_v11  ;;  %v1416_v13 = vsel %vm699_vm5, %v1411_v12, 0 }
 0xaf3   : > { %2059 = vmatpush3.bf16.msra.mxu0 %v1416_v13 }
 0xaf4   : > { %2072 = vmatprep.subr.bf16.mxu0 %v2282_v44 }
 0xaf5   : > { %v2143_v46 = vpop.permute.xlu1 %2142 }
 0xaf6   : > { %v2145_v50 = vunpack.i.h.bf16 %v2143_v46  ;;  %v2144_v52 = vunpack.i.l.bf16 %v2143_v46 }
 0xaf8   : > { %v1483_v60 = vsel %vm569_vm3, %v2540_v61, %v2145_v50  ;;  %v1482_v62 = vsel %vm569_vm3, %v2538_v57, %v2144_v52  ;;  %v2167_v57 = vld [vmem:[%s2399_s16 + $0x8] sm:$0xff]  }
 0xaf9   : > { %v2148_v49 = vpop.permute.xlu1 %2147 }
 0xafa   : > { %v2199_v23 = vpop.eup %2198  ;;  %v2150_v55 = vunpack.i.h.bf16 %v2148_v49  ;;  %v2149_v58 = vunpack.i.l.bf16 %v2148_v49 }
 0xafb   : > { %v1350_v48 = vsel %vm569_vm3, %v2199_v23, 0.0 }
 0xafc   : > { %v2201_v53 = vpop.eup %2200  ;;  %1351 = vadd.xlane.f32.xlu0 %v1350_v48  ;;  %v1486_v1 = vsel %vm1484_vm6, %v1483_v60, %v2150_v55  ;;  %v1485_v3 = vsel %vm1484_vm6, %v1482_v62, %v2149_v58 }
 0xafd   : > { %v1353_v54 = vsel %vm569_vm3, %v2201_v53, 0.0 }
 0xb00   : > { %1354 = vadd.xlane.f32.xlu0 %v1353_v54  ;;  %v2168_v54 = vld [vmem:[%s2399_s16 + $0x10] sm:$0xff]  }
 0xb16   : > { %1362 = vrot.lane.b32.xlu0 %v2515_v38, %s2293_s11  ;;  %v2162_v38 = vld [vmem:[%s2394_s13] sm:$0xff]   ;;  %s2296_s13 = smov 24  }
 0xb89   : > { %v1352_v14 = vpop.xlane.xlu0 %1351 }
 0xb8a   : > { %2202 = vrcp.f32 %v1352_v14  ;;  %v2169_v14 = vld [vmem:[%s2399_s16 + $0x18] sm:$0xff]  }
 0xb8d   : > { %v1355_v15 = vpop.xlane.xlu0 %1354 }
 0xb8e   : > { %2204 = vrcp.f32 %v1355_v15 }
 0xb91   : > { %v1363_v16 = vpop.permute.xlu0 %1362 }
 0xb92   : > { %v1368_v17 = vsel %vm699_vm5, %v1363_v16, 0  ;;  %v2214_v16 = vld [vmem:[#allocation2] sm:$0xff] }
 0xb93   : > { %2053 = vmatpush3.bf16.msra.mxu1 %v1368_v17 }
 0xb94   : > { %v2203_v18 = vpop.eup %2202  ;;  %2064 = vmatprep.subr.bf16.mxu1 %v2282_v44 }
 0xb95   : > { %v1357_v19 = vmul.f32 %v2203_v18, %v2199_v23 }
 0xb97   : > { %v1360_v51 = vpack.c.bf16 %v1357_v19, %v1357_v19 }
 0xb98   : > { %v2205_v56 = vpop.eup %2204 }
 0xb99   : > { %v1359_v20 = vmul.f32 %v2205_v56, %v2201_v53  ;;  %2055 = vmatmul.mubr.msk.bf16.vlgmr.msra.gmra.mrb[28].mxu1 %vm569_vm3, %v1360_v51  ;;  %v2215_v51 = vld [vmem:[#allocation2 + $0x8] sm:$0xff] }
 0xb9a   : > { %2068 = vmatprep.mubr.msk.bf16.mxu1 %vm2283_vm2, %v2282_v44  ;;  %2065 = vmatpush3.bf16.msra.mxu1 %v2164_v22 }
 0xb9b   : > { %v1361_v6 = vpack.c.bf16 %v1359_v20, %v1359_v20  ;;  %2066 = vmatprep.subr.bf16.mxu1 %v2282_v44 }
 0xb9d   : > { %2061 = vmatmul.mubr.msk.bf16.vlgmr.msra.gmra.mrb[32].mxu0 %vm569_vm3, %v1361_v6 }
 0xb9e   : > { %2073 = vmatpush3.bf16.msra.mxu0 %v2162_v38  ;;  %2076 = vmatprep.mubr.msk.bf16.mxu0 %vm2283_vm2, %v2282_v44 }
 0xb9f   : > { %2074 = vmatprep.subr.bf16.mxu0 %v2282_v44  ;;  %2067 = vmatpush3.bf16.msra.mxu1 %v2165_v24 }
 0xba0   : > { %2080 = vmatprep.subr.bf16.mxu1 %v2282_v44 }
 0xba2   : > { %2075 = vmatpush3.bf16.msra.mxu0 %v2163_v21 }
 0xba5   : > { %2077 = vmatmul.mubr.msk.bf16.vlgmr.msra.gmra.mrb[36].mxu0 %vm391_vm1, %v2436_v36 }
 0xc6c   : > { %v1404_v25 = vpop.f32.mrb[28].mxu1 }
 0xc6d   : > { %v2056_v26 = vpop.f32.mrb[29].mxu1 }
 0xc6e   : > { %v1407_v27 = vpop.f32.mrb[30].mxu1 }
 0xc6f   : > { %v2057_v28 = vpop.f32.mrb[31].mxu1 }
 0xc70   : > { %v1452_v29 = vpop.f32.mrb[32].mxu0 }
 0xc71   : > { %v2151_v30 = vpack.i.bf16 %v1452_v29, %v1404_v25  ;;  %v2062_v31 = vpop.f32.mrb[33].mxu0 }
 0xc72   : > { %v1455_v32 = vpop.f32.mrb[34].mxu0 }
 0xc73   : > { %v2063_v2 = vpop.f32.mrb[35].mxu0  ;;  %2152 = vrot.lane.b32.xlu0 %v2151_v30, %s2296_s13 }
 0xc78   : > { %v1601_v36 = vpop.f32.mrb[36].mxu0 }
 0xc79   : > { %1622 = vrot.lane.b32.xlu1 %v1601_v36, %s2284_s0  ;;  %v2078_v33 = vpop.f32.mrb[37].mxu0  ;;  %v1608_v39 = vsub.f32 0.0, %v1601_v36 }
 0xc7a   : > { %v1604_v34 = vpop.f32.mrb[38].mxu0 }
 0xc7b   : > { %v2079_v35 = vpop.f32.mrb[39].mxu0  ;;  %1624 = vrot.lane.b32.xlu0 %v1604_v34, %s2284_s0  ;;  %v1609_v40 = vsub.f32 0.0, %v1604_v34  ;;  %v1610_v41 = vmul.f32 1.442695, %v1608_v39  ;;  %v1910_v39 = vld [vmem:[%s2712_s8] ss:$0 sm:$0xff] (!%p1909_p9) }
 0xc7d   : > { %v1612_v42 = vmul.f32 1.442695, %v1609_v40  ;;  %2206 = vpow2.f32 %v1610_v41 }
 0xc7f   : > { %2208 = vpow2.f32 %v1612_v42 }
 0xc87   : > { %v2207_v43 = vpop.eup %2206 }
 0xc88   : > { %v1614_v37 = vadd.f32 1.0, %v2207_v43 }
 0xc89   : > { %v2209_v45 = vpop.eup %2208 }
 0xc8a   : > { %v1615_v47 = vadd.f32 1.0, %v2209_v45  ;;  %2210 = vrcp.f32 %v1614_v37 }
 0xc8c   : > { %2212 = vrcp.f32 %v1615_v47 }
 0xc94   : > { %v2211_v4 = vpop.eup %2210 }
 0xc95   : > { %v1617_v61 = vmul.f32 %v2211_v4, %v1601_v36 }
 0xc96   : > { %v2213_v8 = vpop.eup %2212 }
 0xc97   : > { %v1619_v12 = vmul.f32 %v2213_v8, %v1604_v34 }
 0xce5   : > { %v2153_v59 = vpop.permute.xlu0 %2152 }
 0xce6   : > { %v2155_v63 = vunpack.i.h.bf16 %v2153_v59  ;;  %v2154_v0 = vunpack.i.l.bf16 %v2153_v59 }
 0xce8   : > { %v1489_v10 = vsel %vm1487_vm7, %v1486_v1, %v2155_v63  ;;  %v1488_v5 = vsel %vm1487_vm7, %v1485_v3, %v2154_v0 }
 0xce9   : > { %v1490_v9 = vpack.c.bf16 %v1489_v10, %v1488_v5 }
 0xceb   : > { %v1623_v11 = vpop.permute.xlu1 %1622  ;;  %2069 = vmatmul.mubr.msk.bf16.vlgmr.msra.gmra.mrb[32].mxu1 %vm391_vm1, %v1490_v9 }
 0xcec   : > { %2081 = vmatpush3.bf16.msra.mxu1 %v2166_v7  ;;  %2088 = vmatprep.mubr.msk.bf16.mxu1 %vm2283_vm2, %v2282_v44  ;;  %v1628_v23 = vmul.f32 %v1623_v11, %v1617_v61 }
 0xced   : > { %v1625_v13 = vpop.permute.xlu0 %1624  ;;  %2082 = vmatprep.subr.bf16.mxu1 %v2282_v44 }
 0xcee   : > { %v1629_v48 = vmul.f32 %v1625_v13, %v1619_v12 }
 0xcf0   : > { %v1630_v53 = vpack.c.bf16 %v1629_v48, %v1628_v23  ;;  %2083 = vmatpush3.bf16.msra.mxu1 %v2167_v57 }
 0xcf1   : > { %2084 = vmatprep.subr.bf16.mxu1 %v2282_v44 }
 0xcf4   : > { %2085 = vmatpush3.bf16.msra.mxu1 %v2168_v54 }
 0xcf5   : > { %2086 = vmatprep.subr.bf16.mxu1 %v2282_v44 }
 0xcf8   : > { %2087 = vmatpush3.bf16.msra.mxu1 %v2169_v14 }
 0xcfb   : > { %2089 = vmatmul.mubr.msk.bf16.vlgmr.msra.gmra.mrb[32].mxu1 %vm1663_vm8, %v1630_v53 }
 0xdcd   : > { %1717 = sbr.rel (%p1909_p9) target bundleno = 3853 (0xf0d), region = 67 }
 0xdce   : > { %v1701_v15 = vpop.f32.mrb[32].mxu1 }
 0xdcf   : > { %v2092_v17 = vadd.f32 %v2214_v16, %v1701_v15  ;;  %v2090_v18 = vpop.f32.mrb[33].mxu1 }
 0xdd0   : > { %v1704_v19 = vpop.f32.mrb[34].mxu1 }
 0xdd1   : > { %1712 = vst.msk [vmem:[#allocation2] sm:$0xff] %vm391_vm1, %v2092_v17  ;;  %v2093_v56 = vadd.f32 %v2215_v51, %v1704_v19  ;;  %v2091_v20 = vpop.f32.mrb[35].mxu1  ;;  %v1719_v44 = vsel (!%p1909_p9), %vm391_vm1, %v2092_v17, 0.0 }
 0xdd2   : > { %1720 = vadd.xlane.f32.xlu0 (!%p1909_p9), %v1719_v44 }
 0xdd3   : > { %1713 = vst.msk [vmem:[#allocation2 + $0x8] sm:$0xff] %vm391_vm1, %v2093_v56  ;;  %v1722_v38 = vsel (!%p1909_p9), %vm391_vm1, %v2093_v56, 0.0 }
 0xdd6   : > { %1723 = vadd.xlane.f32.xlu0 %v1722_v38 }
 0xe5f   : > { %v1721_v6 = vpop.xlane.xlu0 %1720 }
 0xe60   : > { %v1725_v21 = vmul.f32 0.03125, %v1721_v6 }
 0xe62   : > { %v1727_v22 = vsub.f32 %v2092_v17, %v1725_v21 }
 0xe63   : > { %v1724_v24 = vpop.xlane.xlu0 %1723 }
 0xe64   : > { %v1726_v25 = vmul.f32 0.03125, %v1724_v24  ;;  %v1729_v26 = vmul.f32 %v1727_v22, %v1727_v22 }
 0xe66   : > { %v1728_v27 = vsub.f32 %v2093_v56, %v1726_v25  ;;  %v1731_v28 = vsel %vm391_vm1, %v1729_v26, 0.0 }
 0xe67   : > { %1732 = vadd.xlane.f32.xlu1 %v1731_v28 }
 0xe68   : > { %v1730_v29 = vmul.f32 %v1728_v27, %v1728_v27 }
 0xe6a   : > { %v1734_v30 = vsel %vm391_vm1, %v1730_v29, 0.0 }
 0xe6b   : > { %1735 = vadd.xlane.f32.xlu1 %v1734_v30 }
 0xef4   : > { %v1733_v31 = vpop.xlane.xlu1 %1732 }
 0xef5   : > { %v1737_v32 = vmul.f32 0.03125, %v1733_v31 }
 0xef7   : > { %v1739_v2 = vadd.f32 1e-05, %v1737_v32 }
 0xef8   : > { %v1736_v36 = vpop.xlane.xlu1 %1735 }
 0xef9   : > { %2216 = vrsqrt.f32 %v1739_v2  ;;  %v1738_v33 = vmul.f32 0.03125, %v1736_v36 }
 0xefb   : > { %v1740_v34 = vadd.f32 1e-05, %v1738_v33 }
 0xefd   : > { %2218 = vrsqrt.f32 %v1740_v34 }
 0xf03   : > { %v2217_v35 = vpop.eup %2216 }
 0xf04   : > { %v1743_v40 = vmul.f32 %v2217_v35, %v1727_v22 }
 0xf06   : > { %v1751_v41 = vmul.f32 %v1910_v39, %v1743_v40 }
 0xf07   : > { %v2219_v42 = vpop.eup %2218 }
 0xf08   : > { %1753 = vst.msk [vmem:[#allocation5] sm:$0xff] %vm391_vm1, %v1751_v41  ;;  %v1744_v43 = vmul.f32 %v2219_v42, %v1728_v27 }
 0xf0a   : > { %v1752_v45 = vmul.f32 %v1910_v39, %v1744_v43 }
 0xf0c   : > { %1754 = vst.msk [vmem:[#allocation5 + $0x8] sm:$0xff] %vm391_vm1, %v1752_v45 }
 0xf0d PF: > { %p2102_p10 = scmp.eq.s32.totalorder %s2367_s20, 1  ;;  %s2297_s14 = smov [#allocation5]  }
 0xf0e   : > { %s1761_s15 = sshll.u32 %s2297_s14, 4  ;;  %s1762_s15 = int_to_ptr.vmem [resolvable:$true] %s1761_s15 }
 0xf0f   : > { %s2230_s17 = scalar_lea.vmem %s1762_s15, 256  ;;  %p2237_p0 = scmp.lt.s32.totalorder %s1762_s15, %s1762_s15 }
 0xf10   : > { %p2231_p11 = scmp.ne.s32.totalorder %s1762_s15, %s2230_s17  ;;  %p2238_p1 = scmp.lt.s32.totalorder %s2230_s17, %s2230_s17 }
 0xf12   : > { %p2232_p12 = pnand %p2231_p11, %p2102_p10  ;;  %p2239_p2 = por %p2238_p1, %p2237_p0 }
 0xf14   : > { %p2233_p13 = pneg %p2232_p12 }
 0xf16   : > { %p2240_p3 = pnand %p2239_p2, %p2233_p13 }
 0xf18   : > { %2243 = shalt.err (!%p2240_p3)
}
 0xf19   : > { %s2244_s0 = scalar_lea.hbm %s2713_s9, 256 }
 0xf1a   : > { %p2245_p4 = scmp.ne.s32.totalorder %s2713_s9, %s2244_s0  ;;  %p2250_p7 = scmp.lt.u32.totalorder %s2244_s0, %s2713_s9 }
 0xf1c   : > { %p2246_p5 = pnand %p2245_p4, %p2102_p10 }
 0xf1e   : > { %p2247_p6 = pneg %p2246_p5 }
 0xf20   : > { %p2252_p8 = pnand %p2250_p7, %p2247_p6 }
 0xf22   : > { %2255 = shalt.err (!%p2252_p8)
}
 0xf23   : > { %s2298_s24 = smov 128  }
 0xf24   : > { %2099 = dma.vmem_to_hbm [thread:$0]  (%p2102_p10), %s1762_s15, 256, %s2713_s9, [#allocation6], %s2298_s24, %s2298_s24, %s2294_s27  }
 0xf25   : > { %2267 = dma.done.wait (%p2102_p10), [#allocation6], 256  }
 0xf26   : > { %2269 = vsyncadd (%p2102_p10), [#allocation6], 4294967040 }
 0xf27 PF: > { %s24_s19 = sadd.s32 1, %s2272_s19  }
 0xf28   : > { %p21_p9 = scmp.ge.s32.totalorder %s24_s19, 4  }
 0xf2a   :  { %23 = sbr.rel (!%p21_p9) target bundleno = 13 (0xd), region = 120 }
 0xf31   :  { %1777 = vsyncpa [#allocation6], 1 }
 0xf32   :  { %1779 = vsyncpa [#allocation6 + $0x1], 1 }

</bundles_post_ra>
